<compile_context>
chip_gen: v6e
topology: v6e:2x2x1
jax: 0.10.0
libtpu: 0.0.40
codegen_flags: <defaults>
</compile_context>

<pallas_src>
import functools

import jax
import jax.numpy as jnp
from jax import lax
from jax.experimental import pallas as pl
from jax.experimental.pallas import tpu as pltpu


# --------------------------------------------------------------------------
# Pallas kernel: full matrix-decomposition inference for a group of G batch
# elements (each element is fully independent).
#   x_ref      : (G, D, N)  data slab                  (lane dim = N)
#   basesT_ref : (G, R, D)  initial L2-normalized bases, transposed (lane = D)
#   out_ref    : (G, D, N)  reconstruction  bases @ coef^T
# --------------------------------------------------------------------------
def _md2d_kernel(x_ref, basesT_ref, out_ref, *, inv_t, steps, eps, group):
    f32 = jnp.float32
    bf16 = jnp.bfloat16

    def dn(c_lhs, c_rhs):
        return (((c_lhs,), (c_rhs,)), ((), ()))

    def process(g):
        # MXU operands in bf16, f32 accumulation; elementwise update math f32.
        x_bf = x_ref[g].astype(bf16)                                 # (D, N)
        basesT = basesT_ref[g].astype(f32)                           # (R, D)

        # ---- p = B0^T @ x -> (R, N); reused for the softmax logits AND as
        #      the numerator of the first multiplicative coef update.
        p = lax.dot_general(basesT.astype(bf16), x_bf, dn(1, 0),
                            preferred_element_type=f32)

        # ---- local_inference init: coef = softmax(inv_t * x^T B, over R) --
        logits = inv_t * p
        logits = logits - jnp.max(logits, axis=0, keepdims=True)
        e = jnp.exp(logits)
        coefT = e * pl.reciprocal(jnp.sum(e, axis=0, keepdims=True),
                                  approx=True)                       # (R, N)

        # ---- `steps` multiplicative-update iterations (NMF local_step) ----
        def body(_, carry):
            coefT, basesT, numerT = carry
            basesT_bf = basesT.astype(bf16)

            # coef update: coef * (x^T B) / (coef (B^T B) + eps)  [transposed]
            btb = lax.dot_general(basesT_bf, basesT_bf, dn(1, 1),
                                  preferred_element_type=f32)        # (R, R)
            denomT = jnp.dot(btb.astype(bf16), coefT.astype(bf16),
                             preferred_element_type=f32)             # (R, N)
            coefT = coefT * numerT * pl.reciprocal(denomT + eps, approx=True)
            coefT_bf = coefT.astype(bf16)

            # bases update: B * (x coef) / (B (coef^T coef) + eps) [transposed]
            # Oriented as x @ coefT^T so only the narrow (<=R-wide) operand /
            # result is transposed — never the (D, N) slab.
            numer_b = lax.dot_general(x_bf, coefT_bf, dn(1, 1),
                                      preferred_element_type=f32)    # (D, R)
            numer_bT = numer_b.T                                     # (R, D), narrow
            ctc = lax.dot_general(coefT_bf, coefT_bf, dn(1, 1),
                                  preferred_element_type=f32)        # (R, R)
            denom_bT = jnp.dot(ctc.astype(bf16), basesT_bf,
                               preferred_element_type=f32)           # (R, D)
            basesT = basesT * numer_bT * pl.reciprocal(denom_bT + eps,
                                                       approx=True)

            # Numerator for the next coef update / compute_coef (fresh bases).
            numerT = lax.dot_general(basesT.astype(bf16), x_bf, dn(1, 0),
                                     preferred_element_type=f32)     # (R, N)
            return coefT, basesT, numerT

        coefT, basesT, numerT = lax.fori_loop(0, steps, body,
                                              (coefT, basesT, p))

        # ---- compute_coef: one more coef refinement (numerT already uses
        #      the final bases, so no extra (R,D,N) matmul is needed) -------
        basesT_bf = basesT.astype(bf16)
        btb = lax.dot_general(basesT_bf, basesT_bf, dn(1, 1),
                              preferred_element_type=f32)
        denomT = jnp.dot(btb.astype(bf16), coefT.astype(bf16),
                         preferred_element_type=f32)
        coefT = coefT * numerT * pl.reciprocal(denomT + eps, approx=False)

        # ---- reconstruction: out[d, n] = sum_r basesT[r, d] * coefT[r, n] --
        # dn(0,0): only the narrow (R, D) operand needs internal transposing.
        recon = lax.dot_general(basesT_bf, coefT.astype(bf16), dn(0, 0),
                                preferred_element_type=f32)          # (D, N)
        out_ref[g] = recon.astype(out_ref.dtype)

    if group == 1:
        process(0)
    else:
        def loop_body(g, carry):
            process(g)
            return carry
        lax.fori_loop(0, group, loop_body, 0)


def _choose_group(batch, slab_bytes, *, target_bytes=2 << 20, min_grid=2):
    """How many batch elements to process per grid step.

    Small slabs are grouped so each step moves ~target_bytes (amortizes the
    ~0.35us per-step overhead), but we keep at least `min_grid` grid steps
    whenever the batch allows it so "parallel" sharding keeps both v7x
    TensorCores busy.
    """
    best = 1
    for g in range(1, batch + 1):
        if batch % g:
            continue
        if g > 1 and (g * slab_bytes > target_bytes
                      or batch // g < min(batch, min_grid)):
            continue
        best = g
    return best


def _vmem_capacity_bytes():
    try:
        return int(getattr(pltpu.get_tpu_info(), "vmem_capacity_bytes",
                           64 << 20))
    except Exception:
        return 64 << 20  # conservative fallback (v7x size)


def md2d_pallas(x_bdn, basesT_init, *, inv_t, steps, eps=1e-6):
    """Run the matrix-decomposition kernel over the (B*S) batch axis.

    x_bdn:       (BS, D, N)   non-negative features
    basesT_init: (BS, R, D)   L2-normalized initial bases, transposed (f32)
    """
    BS, D, N = x_bdn.shape
    R = basesT_init.shape[1]

    in_item = jnp.dtype(x_bdn.dtype).itemsize
    out_item = in_item
    slab_in = D * N * in_item
    slab_out = D * N * out_item

    G = _choose_group(BS, max(slab_in, slab_out))
    grid = (BS // G,)
    # TODO(synk): for BS == 1 on v7x, split the N axis into a second parallel
    # grid dimension so the second TensorCore is not idle.

    # Output is written exactly once at the end of a long compute step, so a
    # single-buffered out_spec hides its writeback under the next step;
    # only worth it when the slab is big enough to matter for VMEM.
    single_buffer_out = (G * slab_out) >= (8 << 20)

    # ---- VMEM budgeting --------------------------------------------------
    vmem_cap = max(_vmem_capacity_bytes() - (8 << 20), 16 << 20)
    out_bufs = 1 if single_buffer_out else 2
    vmem_est = (2 * G * slab_in            # double-buffered input slabs
                + out_bufs * G * slab_out  # output slab buffer(s)
                + 2 * G * R * D * 4        # double-buffered bases blocks
                + D * N * 2                # in-kernel bf16 slab copy
                + D * N * 4                # f32 reconstruction temp
                + 10 * R * (D + N) * 4     # (R,N)/(R,D) intermediates
                + (2 << 20))               # headroom for spills/fusion temps
    if vmem_est > vmem_cap:
        # TODO(synk): tile the N axis inside the kernel (pltpu.emit_pipeline),
        # accumulating ctc and the x@coef partials across N-chunks, instead of
        # requiring the whole (D, N) slab to fit VMEM.
        raise ValueError(
            f"matrix-decomposition slab (D={D}, N={N}, G={G}) needs "
            f"~{vmem_est >> 20} MiB VMEM but only ~{vmem_cap >> 20} MiB is "
            "available on this TPU generation; N-tiling is not implemented.")
    vmem_limit = int(min(max(vmem_est, 16 << 20), vmem_cap))

    # ---- cost estimate (advisory) -----------------------------------------
    big = 2 * R * D * N                 # one (R,D,N)-class product
    small = 2 * R * R * (D + N)         # btb + denomT (or ctc + denom_bT)
    per_elem = (2 * steps + 2) * big + (2 * steps + 1) * small
    cost = pl.CostEstimate(
        flops=int(BS * per_elem),
        transcendentals=int(BS * (R * N                       # softmax exp
                                  + (steps + 2) * R * N       # coef recips
                                  + steps * R * D + N)),      # bases recips
        bytes_accessed=int(BS * (slab_in + slab_out + R * D * 4)),
    )

    kernel = functools.partial(_md2d_kernel, inv_t=float(inv_t),
                               steps=int(steps), eps=float(eps), group=G)

    out_spec_kwargs = {}
    if single_buffer_out:
        out_spec_kwargs["pipeline_mode"] = pl.Buffered(1)

    return pl.pallas_call(
        kernel,
        out_shape=jax.ShapeDtypeStruct((BS, D, N), x_bdn.dtype),
        grid=grid,
        in_specs=[
            pl.BlockSpec((G, D, N), lambda b: (b, 0, 0)),
            pl.BlockSpec((G, R, D), lambda b: (b, 0, 0)),
        ],
        out_specs=pl.BlockSpec((G, D, N), lambda b: (b, 0, 0),
                               **out_spec_kwargs),
        compiler_params=pltpu.CompilerParams(
            dimension_semantics=("parallel",),
            vmem_limit_bytes=vmem_limit),
        cost_estimate=cost,
    )(x_bdn, basesT_init)


# --------------------------------------------------------------------------
# Python wrapper mirroring `_MatrixDecomposition2DBase.forward`
# --------------------------------------------------------------------------
class MatrixDecomposition2D:
    def __init__(self, spatial=True, S=1, R=64, inv_t=100.0,
                 train_steps=6, eval_steps=7, eta=0.9, rand_init=True):
        self.spatial = spatial
        self.S = S
        self.R = R
        self.inv_t = inv_t
        self.train_steps = train_steps
        self.eval_steps = eval_steps
        self.eta = eta            # only used by the rand_init=False path
        self.rand_init = rand_init
        self.training = False     # eval mode -> eval_steps iterations

    def _build_bases(self, key, B, S, D, R):
        # NMF-style bases: uniform[0,1) then L2-normalize along D (dim=1),
        # matching torch.rand + F.normalize(dim=1).  Returned transposed as
        # (B*S, R, D) — the lane-dense layout the kernel expects — in f32.
        bases = jax.random.uniform(key, (B * S, D, R), dtype=jnp.float32)
        norm = jnp.sqrt(jnp.sum(bases * bases, axis=1, keepdims=True))
        bases = bases / jnp.maximum(norm, 1e-12)
        return jnp.swapaxes(bases, 1, 2)

    def __call__(self, x, key):
        # NOTE: the multiplicative NMF updates assume x >= 0 (post-ReLU
        # features), as in the reference module's intended use.
        B, C, H, W = x.shape
        if self.spatial:
            D = C // self.S
            N = H * W
            xr = x.reshape(B * self.S, D, N)
        else:
            D = H * W
            N = C // self.S
            xr = jnp.swapaxes(x.reshape(B * self.S, N, D), 1, 2)

        # rand_init=True branch of the reference module.
        # TODO(synk): the rand_init=False learned-bases path (registered
        # buffer + online momentum/eta update) and the training-time
        # one-step-gradient behavior are not implemented.
        basesT = self._build_bases(key, B, self.S, D, self.R)

        steps = self.train_steps if self.training else self.eval_steps
        out = md2d_pallas(xr, basesT, inv_t=self.inv_t, steps=steps)

        if self.spatial:
            out = out.reshape(B, C, H, W)
        else:
            out = jnp.swapaxes(out, 1, 2).reshape(B, C, H, W)
        return out


if __name__ == "__main__":
    # Small, TPU-friendly shapes: B=2, C=64, H=W=16  -> D=64, N=256, R=64
    # (R matches the module's MD_R default and fills the MXU contraction
    # better than very small R).
    key = jax.random.PRNGKey(0)
    kx, kb = jax.random.split(key)

    B, C, H, W = 2, 64, 16, 16
    # Non-negative input (NMF multiplicative updates assume x >= 0).
    x = jax.random.uniform(kx, (B, C, H, W), dtype=jnp.float32)

    module = MatrixDecomposition2D(spatial=True, S=1, R=64, inv_t=100.0,
                                   train_steps=6, eval_steps=7,
                                   rand_init=True)
    y = module(x, kb)
    y = jax.block_until_ready(y)

    assert y.shape == (B, C, H, W), y.shape
    assert bool(jnp.all(jnp.isfinite(y)))
    print("KERNEL_OK")
</pallas_src>

<mosaic_0001>
module attributes {stable_mosaic.version = 11 : i64} {
  func.func @_md2d_kernel(%arg0: i32, %arg1: memref<1x64x256xf32, #tpu.memory_space<vmem>>, %arg2: memref<1x64x64xf32, #tpu.memory_space<vmem>>, %arg3: memref<1x64x256xf32, #tpu.memory_space<vmem>>) attributes {dimension_semantics = [#tpu.dimension_semantics<parallel>], iteration_bounds = array<i64: 2>, scalar_prefetch = 0 : i64, scratch_operands = 0 : i64, tpu.core_type = #tpu.core_type<tc>, window_params = [{transform_indices = @transform_0, window_bounds = array<i64: 1, 64, 256>}, {transform_indices = @transform_1, window_bounds = array<i64: 1, 64, 64>}, {transform_indices = @transform_2, window_bounds = array<i64: 1, 64, 256>}]} {
    %c0 = arith.constant 0 : index
    %c0_0 = arith.constant 0 : index
    %c0_1 = arith.constant 0 : index
    %0 = vector.load %arg1[%c0, %c0_0, %c0_1] : memref<1x64x256xf32, #tpu.memory_space<vmem>>, vector<1x64x256xf32>
    %1 = vector.shape_cast %0 : vector<1x64x256xf32> to vector<64x256xf32>
    %2 = arith.truncf %1 : vector<64x256xf32> to vector<64x256xbf16>
    %c0_2 = arith.constant 0 : index
    %c0_3 = arith.constant 0 : index
    %c0_4 = arith.constant 0 : index
    %3 = vector.load %arg2[%c0_2, %c0_3, %c0_4] : memref<1x64x64xf32, #tpu.memory_space<vmem>>, vector<1x64x64xf32>
    %4 = vector.shape_cast %3 : vector<1x64x64xf32> to vector<64x64xf32>
    %5 = arith.truncf %4 : vector<64x64xf32> to vector<64x64xbf16>
    %cst = arith.constant dense<0.000000e+00> : vector<64x256xf32>
    %6 = tpu.matmul %5, %2, %cst {dimension_numbers = #tpu.dot_dimension_numbers<[1], [0], [0], [1], [0, 0, 1, 1], [], []>} : vector<64x64xbf16>, vector<64x256xbf16>, vector<64x256xf32> -> vector<64x256xf32>
    %cst_5 = arith.constant 1.000000e+02 : f32
    %7 = vector.broadcast %cst_5 : f32 to vector<64x256xf32>
    %8 = arith.mulf %7, %6 : vector<64x256xf32>
    %cst_6 = arith.constant dense<0xFF800000> : vector<256xf32>
    %9 = vector.multi_reduction <maximumf>, %8, %cst_6 [0] : vector<64x256xf32> to vector<256xf32>
    %10 = vector.shape_cast %9 : vector<256xf32> to vector<1x256xf32>
    %11 = vector.broadcast %10 : vector<1x256xf32> to vector<64x256xf32>
    %12 = arith.subf %8, %11 : vector<64x256xf32>
    %13 = math.exp %12 : vector<64x256xf32>
    %cst_7 = arith.constant dense<0.000000e+00> : vector<256xf32>
    %14 = vector.multi_reduction <add>, %13, %cst_7 [0] : vector<64x256xf32> to vector<256xf32>
    %15 = vector.shape_cast %14 : vector<256xf32> to vector<1x256xf32>
    %16 = tpu.reciprocal %15 {approx = true} : vector<1x256xf32> -> vector<1x256xf32>
    %17 = vector.broadcast %16 : vector<1x256xf32> to vector<64x256xf32>
    %18 = arith.mulf %13, %17 : vector<64x256xf32>
    %c0_i32 = arith.constant 0 : i32
    %c7_i32 = arith.constant 7 : i32
    %19 = arith.addi %c0_i32, %c7_i32 : i32
    %c1_i32 = arith.constant 1 : i32
    %20:3 = scf.for %arg4 = %c0_i32 to %19 step %c1_i32 iter_args(%arg5 = %18, %arg6 = %4, %arg7 = %6) -> (vector<64x256xf32>, vector<64x64xf32>, vector<64x256xf32>)  : i32 {
      %36 = arith.truncf %arg6 : vector<64x64xf32> to vector<64x64xbf16>
      %cst_15 = arith.constant dense<0.000000e+00> : vector<64x64xf32>
      %37 = tpu.matmul %36, %36, %cst_15 {dimension_numbers = #tpu.dot_dimension_numbers<[1], [1], [0], [0], [0, 0, 1, 0], [], []>} : vector<64x64xbf16>, vector<64x64xbf16>, vector<64x64xf32> -> vector<64x64xf32>
      %38 = arith.truncf %37 : vector<64x64xf32> to vector<64x64xbf16>
      %39 = arith.truncf %arg5 : vector<64x256xf32> to vector<64x256xbf16>
      %cst_16 = arith.constant dense<0.000000e+00> : vector<64x256xf32>
      %40 = tpu.matmul %38, %39, %cst_16 {dimension_numbers = #tpu.dot_dimension_numbers<[1], [0], [0], [1], [0, 0, 1, 1], [], []>} : vector<64x64xbf16>, vector<64x256xbf16>, vector<64x256xf32> -> vector<64x256xf32>
      %41 = arith.mulf %arg5, %arg7 : vector<64x256xf32>
      %cst_17 = arith.constant 9.99999997E-7 : f32
      %42 = vector.broadcast %cst_17 : f32 to vector<64x256xf32>
      %43 = arith.addf %40, %42 : vector<64x256xf32>
      %44 = tpu.reciprocal %43 {approx = true} : vector<64x256xf32> -> vector<64x256xf32>
      %45 = arith.mulf %41, %44 : vector<64x256xf32>
      %46 = arith.truncf %45 : vector<64x256xf32> to vector<64x256xbf16>
      %cst_18 = arith.constant dense<0.000000e+00> : vector<64x64xf32>
      %47 = tpu.matmul %2, %46, %cst_18 {dimension_numbers = #tpu.dot_dimension_numbers<[1], [1], [0], [0], [0, 0, 1, 0], [], []>} : vector<64x256xbf16>, vector<64x256xbf16>, vector<64x64xf32> -> vector<64x64xf32>
      %48 = tpu.transpose %47, [1, 0] : vector<64x64xf32> -> vector<64x64xf32>
      %cst_19 = arith.constant dense<0.000000e+00> : vector<64x64xf32>
      %49 = tpu.matmul %46, %46, %cst_19 {dimension_numbers = #tpu.dot_dimension_numbers<[1], [1], [0], [0], [0, 0, 1, 0], [], []>} : vector<64x256xbf16>, vector<64x256xbf16>, vector<64x64xf32> -> vector<64x64xf32>
      %50 = arith.truncf %49 : vector<64x64xf32> to vector<64x64xbf16>
      %cst_20 = arith.constant dense<0.000000e+00> : vector<64x64xf32>
      %51 = tpu.matmul %50, %36, %cst_20 {dimension_numbers = #tpu.dot_dimension_numbers<[1], [0], [0], [1], [0, 0, 1, 1], [], []>} : vector<64x64xbf16>, vector<64x64xbf16>, vector<64x64xf32> -> vector<64x64xf32>
      %52 = arith.mulf %arg6, %48 : vector<64x64xf32>
      %cst_21 = arith.constant 9.99999997E-7 : f32
      %53 = vector.broadcast %cst_21 : f32 to vector<64x64xf32>
      %54 = arith.addf %51, %53 : vector<64x64xf32>
      %55 = tpu.reciprocal %54 {approx = true} : vector<64x64xf32> -> vector<64x64xf32>
      %56 = arith.mulf %52, %55 : vector<64x64xf32>
      %57 = arith.truncf %56 : vector<64x64xf32> to vector<64x64xbf16>
      %cst_22 = arith.constant dense<0.000000e+00> : vector<64x256xf32>
      %58 = tpu.matmul %57, %2, %cst_22 {dimension_numbers = #tpu.dot_dimension_numbers<[1], [0], [0], [1], [0, 0, 1, 1], [], []>} : vector<64x64xbf16>, vector<64x256xbf16>, vector<64x256xf32> -> vector<64x256xf32>
      scf.yield %45, %56, %58 : vector<64x256xf32>, vector<64x64xf32>, vector<64x256xf32>
    }
    %21 = arith.truncf %20#1 : vector<64x64xf32> to vector<64x64xbf16>
    %cst_8 = arith.constant dense<0.000000e+00> : vector<64x64xf32>
    %22 = tpu.matmul %21, %21, %cst_8 {dimension_numbers = #tpu.dot_dimension_numbers<[1], [1], [0], [0], [0, 0, 1, 0], [], []>} : vector<64x64xbf16>, vector<64x64xbf16>, vector<64x64xf32> -> vector<64x64xf32>
    %23 = arith.truncf %22 : vector<64x64xf32> to vector<64x64xbf16>
    %24 = arith.truncf %20#0 : vector<64x256xf32> to vector<64x256xbf16>
    %cst_9 = arith.constant dense<0.000000e+00> : vector<64x256xf32>
    %25 = tpu.matmul %23, %24, %cst_9 {dimension_numbers = #tpu.dot_dimension_numbers<[1], [0], [0], [1], [0, 0, 1, 1], [], []>} : vector<64x64xbf16>, vector<64x256xbf16>, vector<64x256xf32> -> vector<64x256xf32>
    %26 = arith.mulf %20#0, %20#2 : vector<64x256xf32>
    %cst_10 = arith.constant 9.99999997E-7 : f32
    %27 = vector.broadcast %cst_10 : f32 to vector<64x256xf32>
    %28 = arith.addf %25, %27 : vector<64x256xf32>
    %29 = tpu.reciprocal %28 : vector<64x256xf32> -> vector<64x256xf32>
    %30 = arith.mulf %26, %29 : vector<64x256xf32>
    %31 = arith.truncf %30 : vector<64x256xf32> to vector<64x256xbf16>
    %cst_11 = arith.constant dense<0.000000e+00> : vector<64x256xf32>
    %32 = tpu.matmul %21, %31, %cst_11 {dimension_numbers = #tpu.dot_dimension_numbers<[0], [0], [1], [1], [0, 1, 1, 1], [], []>} : vector<64x64xbf16>, vector<64x256xbf16>, vector<64x256xf32> -> vector<64x256xf32>
    %c0_12 = arith.constant 0 : index
    %c0_13 = arith.constant 0 : index
    %c0_14 = arith.constant 0 : index
    %33 = vector.load %arg3[%c0_12, %c0_13, %c0_14] : memref<1x64x256xf32, #tpu.memory_space<vmem>>, vector<1x64x256xf32>
    %34 = vector.shape_cast %33 : vector<1x64x256xf32> to vector<64x256xf32>
    %35 = vector.shape_cast %32 : vector<64x256xf32> to vector<1x64x256xf32>
    tpu.vector_store %arg3[%c0_12, %c0_13, %c0_14], %35 {strides = array<i32>} : memref<1x64x256xf32, #tpu.memory_space<vmem>>, vector<1x64x256xf32>,
    return
  }
  func.func @transform_0(%arg0: i32) -> (i32, i32, i32) {
    %c0_i32 = arith.constant 0 : i32
    %c0_i32_0 = arith.constant 0 : i32
    %c0_i32_1 = arith.constant 0 : i32
    return %arg0, %c0_i32, %c0_i32_0 : i32, i32, i32
  }
  func.func @transform_1(%arg0: i32) -> (i32, i32, i32) {
    %c0_i32 = arith.constant 0 : i32
    %c0_i32_0 = arith.constant 0 : i32
    %c0_i32_1 = arith.constant 0 : i32
    return %arg0, %c0_i32, %c0_i32_0 : i32, i32, i32
  }
  func.func @transform_2(%arg0: i32) -> (i32, i32, i32) {
    %c0_i32 = arith.constant 0 : i32
    %c0_i32_0 = arith.constant 0 : i32
    %c0_i32_1 = arith.constant 0 : i32
    return %arg0, %c0_i32, %c0_i32_0 : i32, i32, i32
  }
}

</mosaic_0001>

<bundles_post_ra>
// kernel: tpu_custom_call.1
= control target key start
LH: loop header
LB: loop body
LE: loop exit
PB: predicated region body
PF: predicated region fallthrough
CT: control target
= control target key end

     0   :  { %7 = vsyncpa [#allocation3], 0  ;;  %s3952_s0 = inlined_call_operand.hbm [shape: f32[2,64,256], index: 0, kind: input, shape index: {}]   ;;  %s3953_s1 = inlined_call_operand.hbm [shape: f32[2,64,64], index: 1, kind: input, shape index: {}]   ;;  %s3954_s2 = inlined_call_operand.hbm [shape: f32[2,64,256], index: 2, kind: output, shape index: {}]  }
   0x1   :  { %9 = vsyncpa [#allocation3 + $0x1], 0 }
   0x2   :  { %10 = vsyncpa [#allocation6], 0 }
   0x3   :  { %12 = vsyncpa [#allocation6 + $0x1], 0 }
   0x4   :  { %13 = vsyncpa [#allocation4], 0 }
   0x5   :  { %15 = vsyncpa [#allocation4 + $0x1], 0  ;;  %s2822_s9 = smov 0   ;;  %s2824_s10 = smov 0  }
   0x6   :  { %s2826_s11 = smov 0   ;;  %s2828_s12 = smov 0  }
   0x7 LB: > { %s2843_s13 = sadd.s32 4294967295, %s2630_s12   ;;  %s1681_s14 = sadd.s32 4294967294, %s2630_s12   ;;  %s2630_s12 = sphi %s2828_s12, %s4169_s12   ;;  %s2626_s11 = sphi %s2826_s11, %s4168_s11   ;;  %s2622_s10 = sphi %s2824_s10, %s4167_s10   ;;  %s2618_s9 = sphi %s2822_s9, %s4166_s9  }
   0x8   : > { %s2847_s15 = sadd.s32 1, %s2630_s12   ;;  %s28_s16 = sadd.s32 1, %s2626_s11 }
   0x9   : > { %s25_s17 = ssub.s32 %s2630_s12, %s2847_s15  ;;  %p35_p0 = scmp.ne.s32.totalorder %s2626_s11, %s2622_s10 }
   0xa   : > { %p26_p1 = scmp.eq.s32.totalorder %s25_s17, 0  ;;  %p36_p2 = scmp.eq.s32.totalorder %s2630_s12, 0 }
   0xb   : > { %p41_p3 = scmp.ne.s32.totalorder %s2622_s10, %s2618_s9  ;;  %p42_p4 = scmp.eq.s32.totalorder %s2843_s13, 0 }
   0xc   : > { %s2859_s18 = scalar_select %p26_p1, %s2626_s11, %s28_s16  }
   0xd   : > { %p2861_p5 = por %p36_p2, %p35_p0  ;;  %p2865_p6 = por %p42_p4, %p41_p3 }
   0xe   : > { %p91_p7 = scmp.eq.s32.totalorder %s2843_s13, 1  ;;  %p97_p8 = scmp.eq.s32.totalorder %s1681_s14, 1 }
   0xf   : > { %s4010_s20 = scalar_select %p2865_p6, 1, 0 }
  0x10   : > { %p1855_p10 = scmp.lt.s32.totalorder %s2630_s12, 2  ;;  %p2872_p11 = por %p91_p7, %p35_p0 }
  0x11   : > { %p2876_p12 = por %p97_p8, %p41_p3  ;;  %s2881_s23 = sand.u32 1, %s2626_s11  }
  0x12   : > { %s4011_s21 = scalar_select %p2872_p11, 1, 0 }
  0x13   : > { %s4012_s22 = scalar_select %p2876_p12, 1, 0 }
  0x14   : > { %s1731_s24 = sshll.u32 %s2630_s12, 11  ;;  %s1684_s25 = sshll.u32 %s2881_s23, 7 }
  0x15   : > { %s2888_s28 = scalar_lea.hbm %s3952_s0, %s1731_s24  ;;  %s121_s29 = scalar_lea.vmem [#allocation2], %s1684_s25 }
  0x16   : > { %s128_s30 = sshll.u32 %s121_s29, 4  ;;  %p2892_p13 = pnand %p1855_p10, %p2861_p5  ;;  %s2896_s30 = int_to_ptr.vmem [resolvable:$true] %s128_s30 }
  0x17   : > { %s118_s4 = scalar_lea.sflag [#allocation3], %s2881_s23  ;;  %s2342_s5 = scalar_lea.hbm %s2888_s28, 2048 }
  0x18   : > { %p2343_p0 = scmp.ne.s32.totalorder %s2888_s28, %s2342_s5  ;;  %p2344_p1 = pneg %p2892_p13 }
  0x19   : > { %s2347_s8 = scalar_lea.hbm %s3952_s0, 4096  ;;  %p2348_p4 = scmp.lt.s32.totalorder %s2888_s28, %s3952_s0 }
  0x1a   : > { %p2345_p2 = pnand %p2344_p1, %p2343_p0  ;;  %p2349_p5 = scmp.lt.s32.totalorder %s2347_s8, %s2342_s5 }
  0x1c   : > { %p2346_p3 = pneg %p2345_p2  ;;  %p2350_p7 = por %p2349_p5, %p2348_p4 }
  0x1e   : > { %p2351_p8 = pnand %p2350_p7, %p2346_p3 }
  0x20   : > { %2354 = shalt.err (!%p2351_p8)
}
  0x21   : > { %s2355_s17 = scalar_lea.vmem %s2896_s30, 2048  ;;  %s2796_s19 = smov [#allocation2]  }
  0x22   : > { %p2356_p10 = scmp.ne.s32.totalorder %s2896_s30, %s2355_s17  ;;  %s2360_s24 = sshll.u32 %s2796_s19, 4  ;;  %s2361_s24 = int_to_ptr.vmem [resolvable:$false] %s2360_s24 }
  0x23   : > { %s2362_s25 = scalar_lea.vmem %s2361_s24, 4096  ;;  %p2363_p9 = scmp.lt.s32.totalorder %s2896_s30, %s2361_s24 }
  0x24   : > { %p2358_p0 = pnand %p2356_p10, %p2344_p1  ;;  %p2364_p12 = scmp.lt.s32.totalorder %s2362_s25, %s2355_s17 }
  0x26   : > { %p2359_p2 = pneg %p2358_p0  ;;  %p2365_p11 = por %p2364_p12, %p2363_p9 }
  0x28   : > { %p2366_p4 = pnand %p2365_p11, %p2359_p2 }
  0x2a   : > { %2369 = shalt.err (!%p2366_p4)
}
  0x2b   : > { %s2797_s26 = smov 256   ;;  %s2798_s27 = smov 16  }
  0x2c   : > { %1847 = dma.hbm_to_vmem [thread:$0]  (!%p2892_p13), %s2888_s28, 2048, %s2896_s30, %s118_s4, %s2797_s26, %s2797_s26, %s2798_s27  }
  0x2d   : > { %p1690_p3 = scmp.ge.s32.totalorder %s2630_s12, 1  ;;  %p157_p5 = scmp.lt.s32.totalorder %s2630_s12, 3 }
  0x2e   : > { %s1687_s29 = sshll.u32 %s2881_s23, 6  ;;  %s1732_s6 = sshll.u32 %s2630_s12, 10 }
  0x2f   : > { %p2928_p9 = pnand %p1690_p3, %p157_p5  ;;  %s142_s7 = scalar_lea.vmem [#allocation5], %s1687_s29 }
  0x30   : > { %s149_s8 = sshll.u32 %s142_s7, 4  ;;  %s2936_s17 = scalar_lea.hbm %s3953_s1, %s1732_s6  ;;  %s2938_s8 = int_to_ptr.vmem [resolvable:$true] %s149_s8 }
  0x31   : > { %s139_s28 = scalar_lea.sflag [#allocation6], %s2881_s23  ;;  %s2370_s30 = scalar_lea.hbm %s2936_s17, 1024 }
  0x32   : > { %p2371_p11 = scmp.ne.s32.totalorder %s2936_s17, %s2370_s30  ;;  %s2375_s24 = scalar_lea.hbm %s3953_s1, 2048 }
  0x33   : > { %p2376_p8 = scmp.lt.s32.totalorder %s2936_s17, %s3953_s1  ;;  %p2377_p10 = scmp.lt.s32.totalorder %s2375_s24, %s2370_s30 }
  0x34   : > { %p2373_p12 = pnand %p2371_p11, %p2344_p1 }
  0x35   : > { %p2378_p0 = por %p2377_p10, %p2376_p8 }
  0x36   : > { %p2374_p7 = pneg %p2373_p12 }
  0x38   : > { %p2379_p2 = pnand %p2378_p0, %p2374_p7 }
  0x3a   : > { %2382 = shalt.err (!%p2379_p2)
}
  0x3b   : > { %s2383_s27 = scalar_lea.vmem %s2938_s8, 1024  ;;  %s2799_s29 = smov [#allocation5]  }
  0x3c   : > { %p2384_p4 = scmp.ne.s32.totalorder %s2938_s8, %s2383_s27  ;;  %s2388_s6 = sshll.u32 %s2799_s29, 4  ;;  %s2389_s6 = int_to_ptr.vmem [resolvable:$false] %s2388_s6 }
  0x3d   : > { %s2390_s7 = scalar_lea.vmem %s2389_s6, 2048  ;;  %p2391_p11 = scmp.lt.s32.totalorder %s2938_s8, %s2389_s6 }
  0x3e   : > { %p2386_p3 = pnand %p2384_p4, %p2344_p1  ;;  %p2392_p12 = scmp.lt.s32.totalorder %s2390_s7, %s2383_s27 }
  0x40   : > { %p2387_p5 = pneg %p2386_p3  ;;  %p2393_p6 = por %p2392_p12, %p2391_p11 }
  0x42   : > { %p2394_p8 = pnand %p2393_p6, %p2387_p5 }
  0x44   : > { %2397 = shalt.err (!%p2394_p8)
}
  0x45   : > { %s2800_s14 = smov 128   ;;  %s2801_s16 = smov 8  }
  0x46   : > { %1850 = dma.hbm_to_vmem [thread:$0]  (!%p2892_p13), %s2936_s17, 1024, %s2938_s8, %s139_s28, %s2800_s14, %s2800_s14, %s2801_s16  }
  0x47   : > { %161 = sbr.rel (%p2928_p9) target bundleno = 2242 (0x8c2), region = 28 }
  0x4c   : > { %s2968_s30 = sand.u32 1, %s2622_s10   ;;  %p4015_p6 = scmp.ne.s32.totalorder %s4010_s20, 0 }
  0x4d   : > { %s1691_s4 = sshll.u32 %s2968_s30, 7  ;;  %s164_s19 = scalar_lea.sflag [#allocation3], %s2968_s30 }
  0x4e   : > { %s2974_s24 = scalar_lea.vmem [#allocation2], %s1691_s4 }
  0x4f   : > { %2605 = dma.done.wait (%p4015_p6), %s164_s19, 2048  }
  0x50   : > { %2607 = vsyncadd (%p4015_p6), %s164_s19, 4294965248  ;;  %s1692_s23 = sshll.u32 %s2968_s30, 6  ;;  %s173_s3 = scalar_lea.sflag [#allocation6], %s2968_s30 }
  0x51   : > { %s2982_s5 = scalar_lea.vmem [#allocation5], %s1692_s23 }
  0x52   : > { %2609 = dma.done.wait (%p4015_p6), %s173_s3, 1024  }
  0x53   : > { %2611 = vsyncadd (%p4015_p6), %s173_s3, 4294966272  ;;  %v3957_v0 = vmov 0   ;;  %v216_v1 = vld [vmem:[%s2974_s24 + $0x68] sm:$0xff]  ;;  %v218_v2 = vld [vmem:[%s2974_s24 + $0x78] sm:$0xff]  ;;  %vm239_vm0 = vcmask 523264   ;;  %s3150_s20 = scalar_lea.vmem [#allocation7], %s1691_s4 }
  0x54   : > { %284 = vmatprep.mubr.bf16.mxu0 %v3957_v0  ;;  %304 = vmatprep.mubr.bf16.mxu1 %v3957_v0  ;;  %v215_v3 = vld [vmem:[%s2974_s24 + $0x60] sm:$0xff]  ;;  %v2993_v4 = vpack.c.bf16 %v218_v2, %v216_v1  ;;  %v217_v5 = vld [vmem:[%s2974_s24 + $0x70] sm:$0xff]  ;;  %v212_v6 = vld [vmem:[%s2974_s24 + $0x48] sm:$0xff]  ;;  %s3256_s8 = smov 0  }
  0x55   : > { %v214_v7 = vld [vmem:[%s2974_s24 + $0x58] sm:$0xff]  ;;  %v2998_v8 = vpack.c.bf16 %v217_v5, %v215_v3  ;;  %v211_v10 = vld [vmem:[%s2974_s24 + $0x40] sm:$0xff]  ;;  %v213_v11 = vld [vmem:[%s2974_s24 + $0x50] sm:$0xff] }
  0x56   : > { %4016 = vst [vmem:[#allocation11_spill] sm:$0xff] %v2993_v4  ;;  %v3000_v9 = vpack.c.bf16 %v214_v7, %v212_v6  ;;  %v208_v12 = vld [vmem:[%s2974_s24 + $0x28] sm:$0xff]  ;;  %260 = vmatprep.subr.bf16.mxu0 %v2993_v4  ;;  %1806 = vmatprep.subr.bf16.mxu1 %v2993_v4  ;;  %v210_v13 = vld [vmem:[%s2974_s24 + $0x38] sm:$0xff]  ;;  %v3010_v14 = vpack.c.bf16 %v213_v11, %v211_v10  ;;  %v207_v16 = vld [vmem:[%s2974_s24 + $0x20] sm:$0xff] }
  0x57   : > { %4017 = vst [vmem:[#allocation12_spill] sm:$0xff] %v2998_v8  ;;  %261 = vmatpush1.bf16.msra.mxu0 %v2998_v8  ;;  %1810 = vmatpush1.bf16.msra.mxu1 %v2998_v8  ;;  %v3014_v15 = vpack.c.bf16 %v210_v13, %v208_v12  ;;  %v209_v17 = vld [vmem:[%s2974_s24 + $0x30] sm:$0xff]  ;;  %v204_v18 = vld [vmem:[%s2974_s24 + $0x8] sm:$0xff]  ;;  %v206_v19 = vld [vmem:[%s2974_s24 + $0x18] sm:$0xff] }
  0x58   : > { %4018 = vst [vmem:[#allocation13_spill] sm:$0xff] %v3000_v9  ;;  %4019 = vst [vmem:[#allocation14_spill] sm:$0xff] %v3010_v14  ;;  %262 = vmatprep.subr.bf16.mxu0 %v3000_v9  ;;  %1807 = vmatprep.subr.bf16.mxu1 %v3000_v9  ;;  %v3022_v20 = vpack.c.bf16 %v209_v17, %v207_v16  ;;  %v3026_v21 = vpack.c.bf16 %v206_v19, %v204_v18  ;;  %v203_v22 = vld [vmem:[%s2974_s24] sm:$0xff]  ;;  %v205_v23 = vld [vmem:[%s2974_s24 + $0x10] sm:$0xff] }
  0x59   : > { %4020 = vst [vmem:[#allocation15_spill] sm:$0xff] %v3014_v15  ;;  %v3031_v24 = vld [vmem:[%s2982_s5] sm:$0xff]   ;;  %v3035_v25 = vpack.c.bf16 %v205_v23, %v203_v22  ;;  %v3038_v26 = vld [vmem:[%s2982_s5 + $0x8] sm:$0xff]   ;;  %v3057_v31 = vld [vmem:[%s2982_s5 + $0x10] sm:$0xff]  }
  0x5a   : > { %4021 = vst [vmem:[#allocation16_spill] sm:$0xff] %v3022_v20  ;;  %4022 = vst [vmem:[#allocation17_spill] sm:$0xff] %v3026_v21  ;;  %v3041_v27 = vld [vmem:[%s2982_s5 + $0x20] sm:$0xff]   ;;  %v3044_v28 = vld [vmem:[%s2982_s5 + $0x28] sm:$0xff]   ;;  %v235_v29 = vpack.c.bf16 %v3038_v26, %v3031_v24 }
  0x5b   : > { %263 = vmatpush1.bf16.msra.mxu0 %v3010_v14  ;;  %1811 = vmatpush1.bf16.msra.mxu1 %v3010_v14  ;;  %4023 = vst [vmem:[#allocation18_spill] sm:$0xff] %v3035_v25  ;;  %v237_v30 = vpack.c.bf16 %v3044_v28, %v3041_v27  ;;  %v3062_v32 = vld [vmem:[%s2982_s5 + $0x18] sm:$0xff]   ;;  %v3065_v33 = vld [vmem:[%s2982_s5 + $0x30] sm:$0xff]  }
  0x5c   : > { %264 = vmatprep.subr.bf16.mxu0 %v3014_v15  ;;  %1808 = vmatprep.subr.bf16.mxu1 %v3014_v15  ;;  %v3068_v34 = vld [vmem:[%s2982_s5 + $0x38] sm:$0xff]   ;;  %v236_v35 = vpack.c.bf16 %v3062_v32, %v3057_v31 }
  0x5d   : > { %v238_v36 = vpack.c.bf16 %v3068_v34, %v3065_v33 }
  0x5f   : > { %265 = vmatpush1.bf16.msra.mxu0 %v3022_v20  ;;  %1812 = vmatpush1.bf16.msra.mxu1 %v3022_v20 }
  0x60   : > { %266 = vmatprep.subr.bf16.mxu0 %v3026_v21  ;;  %1809 = vmatprep.subr.bf16.mxu1 %v3026_v21 }
  0x63   : > { %267 = vmatpush1.bf16.msra.mxu0 %v3035_v25  ;;  %1813 = vmatpush1.bf16.msra.mxu1 %v3035_v25 }
  0x66   : > { %1694 = vmatmul.mubr.msk.bf16.vlgmr.msra.gmra.mxu0 %vm239_vm0, %v235_v29  ;;  %1696 = vmatmul.mubr.msk.bf16.vlgmr.msra.gmra.mxu1 %vm239_vm0, %v237_v30 }
  0x67   : > { %294 = vmatprep.mubr.bf16.mxu0 %v3957_v0  ;;  %314 = vmatprep.mubr.bf16.mxu1 %v3957_v0 }
  0x6e   : > { %1695 = vmatmul.mubr.msk.bf16.gmra.mxu0 %vm239_vm0, %v236_v35  ;;  %1697 = vmatmul.mubr.msk.bf16.gmra.mxu1 %vm239_vm0, %v238_v36 }
 0x126   : > { %v3076_v37 = vpop.f32.mrf.mxu0   ;;  %v3078_v38 = vpop.f32.mrf.mxu1  }
 0x127   : > { %v325_v47 = vmul.f32 100.0, %v3076_v37  ;;  %v333_v56 = vmul.f32 100.0, %v3078_v38 }
 0x128   : > { %v3080_v39 = vpop.f32.mrf.mxu0   ;;  %v3082_v40 = vpop.f32.mrf.mxu1  }
 0x129   : > { %v3103_v51 = vmul.f32 100.0, %v3080_v39  ;;  %v3118_v60 = vmul.f32 100.0, %v3082_v40 }
 0x12a   : > { %v3084_v41 = vpop.f32.mrf.mxu0   ;;  %v3086_v42 = vpop.f32.mrf.mxu1  }
 0x12b   : > { %v327_v57 = vmul.f32 100.0, %v3084_v41  ;;  %v335_v61 = vmul.f32 100.0, %v3086_v42 }
 0x12c   : > { %v3088_v43 = vpop.f32.mrf.mxu0   ;;  %v3090_v44 = vpop.f32.mrf.mxu1  }
 0x12d   : > { %v328_v62 = vmul.f32 100.0, %v3088_v43  ;;  %v3127_v6 = vmul.f32 100.0, %v3090_v44 }
 0x12e   : > { %v3092_v45 = vpop.f32.mrf.mxu0   ;;  %v3094_v46 = vpop.f32.mrf.mxu1  }
 0x12f   : > { %v329_v48 = vmul.f32 100.0, %v3092_v45  ;;  %v337_v1 = vmul.f32 100.0, %v3094_v46 }
 0x130   : > { %v3098_v49 = vpop.f32.mrf.mxu0   ;;  %v3100_v50 = vpop.f32.mrf.mxu1  }
 0x131   : > { %v341_v52 = vmax.f32 %v325_v47, %v329_v48  ;;  %v3106_v53 = vmul.f32 100.0, %v3098_v49  ;;  %v3134_v16 = vmul.f32 100.0, %v3100_v50 }
 0x132   : > { %v3108_v54 = vpop.f32.mrf.mxu0   ;;  %v3110_v55 = vpop.f32.mrf.mxu1  }
 0x133   : > { %v354_v58 = vmax.f32 %v3103_v51, %v3106_v53  ;;  %v331_v59 = vmul.f32 100.0, %v3108_v54  ;;  %v343_v2 = vmax.f32 %v341_v52, %v333_v56  ;;  %v339_v11 = vmul.f32 100.0, %v3110_v55 }
 0x134   : > { %v3122_v63 = vpop.f32.mrf.mxu0   ;;  %v3129_v7 = vpop.f32.mrf.mxu1  }
 0x135   : > { %v342_v3 = vmax.f32 %v327_v57, %v331_v59  ;;  %v332_v5 = vmul.f32 100.0, %v3122_v63  ;;  %v356_v10 = vmax.f32 %v354_v58, %v3118_v60  ;;  %v345_v17 = vmax.f32 %v343_v2, %v337_v1 }
 0x136   : > { %v3137_v19 = vmul.f32 100.0, %v3129_v7 }
 0x137   : > { %v344_v12 = vmax.f32 %v342_v3, %v335_v61  ;;  %v355_v13 = vmax.f32 %v328_v62, %v332_v5  ;;  %v358_v23 = vmax.f32 %v356_v10, %v3134_v16 }
 0x139   : > { %v346_v18 = vmax.f32 %v344_v12, %v339_v11  ;;  %v357_v22 = vmax.f32 %v355_v13, %v3127_v6 }
 0x13b   : > { %v347_v29 = vmax.f32 %v345_v17, %v346_v18  ;;  %v359_v30 = vmax.f32 %v357_v22, %v3137_v19 }
 0x13d   : > { %v348_v35 = vrot.slane %v347_v29, 4  ;;  %v360_v36 = vmax.f32 %v358_v23, %v359_v30 }
 0x13f   : > { %v349_v52 = vmax.f32 %v347_v29, %v348_v35  ;;  %v361_v58 = vrot.slane %v360_v36, 4 }
 0x141   : > { %v350_v3 = vrot.slane %v349_v52, 2  ;;  %v362_v0 = vmax.f32 %v360_v36, %v361_v58 }
 0x143   : > { %v351_v20 = vmax.f32 %v349_v52, %v350_v3  ;;  %v363_v14 = vrot.slane %v362_v0, 2 }
 0x145   : > { %v352_v2 = vrot.slane %v351_v20, 1  ;;  %v364_v12 = vmax.f32 %v362_v0, %v363_v14 }
 0x147   : > { %v353_v9 = vmax.f32 %v351_v20, %v352_v2  ;;  %v365_v8 = vrot.slane %v364_v12, 1 }
 0x149   : > { %v367_v15 = vsub.f32 %v325_v47, %v353_v9  ;;  %v369_v25 = vsub.f32 %v327_v57, %v353_v9  ;;  %v371_v13 = vsub.f32 %v329_v48, %v353_v9  ;;  %v373_v4 = vsub.f32 %v331_v59, %v353_v9 }
 0x14a   : > { %v375_v10 = vsub.f32 %v333_v56, %v353_v9  ;;  %v366_v22 = vmax.f32 %v364_v12, %v365_v8  ;;  %v377_v21 = vsub.f32 %v335_v61, %v353_v9  ;;  %v379_v36 = vsub.f32 %v337_v1, %v353_v9 }
 0x14b   : > { %v383_v17 = vmul.f32 1.442695, %v367_v15  ;;  %v387_v18 = vmul.f32 1.442695, %v369_v25  ;;  %v391_v23 = vmul.f32 1.442695, %v371_v13  ;;  %v381_v47 = vsub.f32 %v339_v11, %v353_v9 }
 0x14c   : > { %v368_v29 = vsub.f32 %v3103_v51, %v366_v22  ;;  %v395_v30 = vmul.f32 1.442695, %v373_v4  ;;  %v370_v35 = vsub.f32 %v328_v62, %v366_v22  ;;  %v399_v0 = vmul.f32 1.442695, %v375_v10 }
 0x14d   : > { %2226 = vpow2.f32 %v383_v17  ;;  %v403_v14 = vmul.f32 1.442695, %v377_v21  ;;  %v372_v20 = vsub.f32 %v3106_v53, %v366_v22  ;;  %v374_v15 = vsub.f32 %v332_v5, %v366_v22 }
 0x14e   : > { %2228 = vpow2.f32 %v387_v18  ;;  %v385_v48 = vmul.f32 1.442695, %v368_v29  ;;  %v389_v25 = vmul.f32 1.442695, %v370_v35  ;;  %v407_v8 = vmul.f32 1.442695, %v379_v36 }
 0x14f   : > { %2230 = vpow2.f32 %v391_v23  ;;  %v376_v56 = vsub.f32 %v3118_v60, %v366_v22  ;;  %v393_v51 = vmul.f32 1.442695, %v372_v20  ;;  %v411_v57 = vmul.f32 1.442695, %v381_v47 }
 0x150   : > { %2232 = vpow2.f32 %v395_v30  ;;  %v378_v4 = vsub.f32 %v3127_v6, %v366_v22  ;;  %v397_v59 = vmul.f32 1.442695, %v374_v15  ;;  %v380_v21 = vsub.f32 %v3134_v16, %v366_v22 }
 0x151   : > { %2234 = vpow2.f32 %v399_v0  ;;  %v401_v9 = vmul.f32 1.442695, %v376_v56  ;;  %v382_v61 = vsub.f32 %v3137_v19, %v366_v22 }
 0x152   : > { %2236 = vpow2.f32 %v403_v14  ;;  %v405_v62 = vmul.f32 1.442695, %v378_v4  ;;  %v409_v5 = vmul.f32 1.442695, %v380_v21 }
 0x153   : > { %2238 = vpow2.f32 %v385_v48  ;;  %v413_v6 = vmul.f32 1.442695, %v382_v61 }
 0x154   : > { %2240 = vpow2.f32 %v389_v25 }
 0x155   : > { %2242 = vpow2.f32 %v407_v8 }
 0x156   : > { %2244 = vpow2.f32 %v393_v51 }
 0x157   : > { %2246 = vpow2.f32 %v411_v57 }
 0x158   : > { %2248 = vpow2.f32 %v397_v59 }
 0x159   : > { %2250 = vpow2.f32 %v401_v9 }
 0x15a   : > { %v2227_v53 = vpop.eup %2226  ;;  %2252 = vpow2.f32 %v405_v62 }
 0x15b   : > { %v2229_v1 = vpop.eup %2228  ;;  %2254 = vpow2.f32 %v409_v5 }
 0x15c   : > { %v415_v60 = vadd.f32 %v2229_v1, %v2227_v53  ;;  %v2231_v11 = vpop.eup %2230  ;;  %2256 = vpow2.f32 %v413_v6 }
 0x15d   : > { %v2233_v58 = vpop.eup %2232 }
 0x15e   : > { %v416_v52 = vadd.f32 %v2231_v11, %v415_v60  ;;  %v2235_v3 = vpop.eup %2234 }
 0x15f   : > { %v2237_v16 = vpop.eup %2236 }
 0x160   : > { %v417_v2 = vadd.f32 %v2233_v58, %v416_v52  ;;  %v2239_v12 = vpop.eup %2238 }
 0x161   : > { %v2241_v10 = vpop.eup %2240 }
 0x162   : > { %v418_v13 = vadd.f32 %v2235_v3, %v417_v2  ;;  %v2243_v19 = vpop.eup %2242  ;;  %v428_v18 = vadd.f32 %v2241_v10, %v2239_v12 }
 0x163   : > { %v2245_v22 = vpop.eup %2244 }
 0x164   : > { %v419_v17 = vadd.f32 %v2237_v16, %v418_v13  ;;  %v2247_v23 = vpop.eup %2246  ;;  %v429_v30 = vadd.f32 %v2245_v22, %v428_v18 }
 0x165   : > { %v2249_v35 = vpop.eup %2248 }
 0x166   : > { %v420_v29 = vadd.f32 %v2243_v19, %v419_v17  ;;  %v430_v0 = vadd.f32 %v2249_v35, %v429_v30  ;;  %v2251_v14 = vpop.eup %2250 }
 0x167   : > { %v2253_v48 = vpop.eup %2252 }
 0x168   : > { %v421_v36 = vadd.f32 %v2247_v23, %v420_v29  ;;  %v431_v47 = vadd.f32 %v2251_v14, %v430_v0  ;;  %v2255_v8 = vpop.eup %2254 }
 0x169   : > { %v2257_v57 = vpop.eup %2256 }
 0x16a   : > { %v422_v20 = vrot.slane %v421_v36, 4  ;;  %v432_v25 = vadd.f32 %v2253_v48, %v431_v47 }
 0x16c   : > { %v423_v15 = vadd.f32 %v422_v20, %v421_v36  ;;  %v433_v51 = vadd.f32 %v2255_v8, %v432_v25 }
 0x16e   : > { %v424_v56 = vrot.slane %v423_v15, 2  ;;  %v434_v59 = vadd.f32 %v2257_v57, %v433_v51 }
 0x170   : > { %v425_v4 = vadd.f32 %v424_v56, %v423_v15  ;;  %v435_v9 = vrot.slane %v434_v59, 4 }
 0x172   : > { %v426_v21 = vrot.slane %v425_v4, 1  ;;  %v436_v62 = vadd.f32 %v435_v9, %v434_v59 }
 0x174   : > { %v427_v61 = vadd.f32 %v426_v21, %v425_v4  ;;  %v437_v60 = vrot.slane %v436_v62, 2 }
 0x176   : > { %2258 = vrcp.f32 %v427_v61  ;;  %v438_v5 = vadd.f32 %v437_v60, %v436_v62 }
 0x178   : > { %v439_v52 = vrot.slane %v438_v5, 1 }
 0x17a   : > { %v440_v6 = vadd.f32 %v439_v52, %v438_v5 }
 0x17c   : > { %2260 = vrcp.f32 %v440_v6 }
 0x183   : > { %v2259_v2 = vpop.eup %2258 }
 0x184   : > { %v443_v13 = vmul.f32 %v2259_v2, %v2227_v53   ;;  %v445_v17 = vmul.f32 %v2259_v2, %v2229_v1   ;;  %v447_v18 = vmul.f32 %v2259_v2, %v2231_v11   ;;  %v449_v29 = vmul.f32 %v2259_v2, %v2233_v58  }
 0x185   : > { %v451_v30 = vmul.f32 %v2259_v2, %v2235_v3   ;;  %v453_v36 = vmul.f32 %v2259_v2, %v2237_v16   ;;  %v455_v0 = vmul.f32 %v2259_v2, %v2243_v19   ;;  %v457_v20 = vmul.f32 %v2259_v2, %v2247_v23  }
 0x189   : > { %v2261_v47 = vpop.eup %2260 }
 0x18a   : > { %v444_v15 = vmul.f32 %v2261_v47, %v2239_v12   ;;  %v446_v25 = vmul.f32 %v2261_v47, %v2241_v10   ;;  %v448_v56 = vmul.f32 %v2261_v47, %v2245_v22   ;;  %v450_v51 = vmul.f32 %v2261_v47, %v2249_v35  }
 0x18b   : > { %v452_v4 = vmul.f32 %v2261_v47, %v2251_v14   ;;  %v454_v59 = vmul.f32 %v2261_v47, %v2253_v48   ;;  %v456_v21 = vmul.f32 %v2261_v47, %v2255_v8   ;;  %v458_v9 = vmul.f32 %v2261_v47, %v2257_v57  }
 0x18c LB: >> { %v3383_v53 = vpack.c.bf16 %v2698_v34, %v2702_v33  ;;  %v3387_v1 = vpack.c.bf16 %v2706_v28, %v2710_v27  ;;  %v3397_v58 = vpack.c.bf16 %v2722_v26, %v2726_v24  ;;  %v597_v3 = vpack.c.bf16 %v2730_v9, %v2738_v21  ;;  %s464_s17 = sadd.s32 1, %s2794_s8   ;;  %s2794_s8 = sphi %s3256_s8, %s4138_s8   ;;  %v2790_v13 = vphi %v443_v13, %v4137_v13   ;;  %v2786_v15 = vphi %v444_v15, %v4136_v15   ;;  %v2782_v17 = vphi %v445_v17, %v4135_v17   ;;  %v2778_v25 = vphi %v446_v25, %v4134_v25   ;;  %v2774_v18 = vphi %v447_v18, %v4133_v18   ;;  %v2770_v56 = vphi %v448_v56, %v4132_v56   ;;  %v2766_v29 = vphi %v449_v29, %v4131_v29   ;;  %v2762_v51 = vphi %v450_v51, %v4130_v51   ;;  %v2758_v30 = vphi %v451_v30, %v4129_v30   ;;  %v2754_v4 = vphi %v452_v4, %v4128_v4   ;;  %v2750_v36 = vphi %v453_v36, %v4127_v36   ;;  %v2746_v59 = vphi %v454_v59, %v4126_v59   ;;  %v2742_v0 = vphi %v455_v0, %v4125_v0   ;;  %v2738_v21 = vphi %v456_v21, %v4124_v21   ;;  %v2734_v20 = vphi %v457_v20, %v4123_v20   ;;  %v2730_v9 = vphi %v458_v9, %v4122_v9   ;;  %v2726_v24 = vphi %v3031_v24, %v3604_v24   ;;  %v2722_v26 = vphi %v3038_v26, %v3606_v26   ;;  %v2718_v31 = vphi %v3057_v31, %v3619_v31   ;;  %v2714_v32 = vphi %v3062_v32, %v3617_v32   ;;  %v2710_v27 = vphi %v3041_v27, %v1002_v27   ;;  %v2706_v28 = vphi %v3044_v28, %v1003_v28   ;;  %v2702_v33 = vphi %v3065_v33, %v1004_v33   ;;  %v2698_v34 = vphi %v3068_v34, %v1005_v34   ;;  %v2694_v37 = vphi %v3076_v37, %v4121_v37   ;;  %v2690_v39 = vphi %v3080_v39, %v4120_v39   ;;  %v2686_v41 = vphi %v3084_v41, %v4119_v41   ;;  %v2682_v43 = vphi %v3088_v43, %v4118_v43   ;;  %v2678_v45 = vphi %v3092_v45, %v4117_v45   ;;  %v2674_v49 = vphi %v3098_v49, %v4116_v49   ;;  %v2670_v54 = vphi %v3108_v54, %v4115_v54   ;;  %v2666_v63 = vphi %v3122_v63, %v4114_v63   ;;  %v2662_v38 = vphi %v3078_v38, %v4113_v38   ;;  %v2658_v40 = vphi %v3082_v40, %v4112_v40   ;;  %v2654_v42 = vphi %v3086_v42, %v4111_v42   ;;  %v2650_v44 = vphi %v3090_v44, %v4110_v44   ;;  %v2646_v46 = vphi %v3094_v46, %v4109_v46   ;;  %v2642_v50 = vphi %v3100_v50, %v4108_v50   ;;  %v2638_v55 = vphi %v3110_v55, %v4107_v55   ;;  %v2634_v7 = vphi %v3129_v7, %v4106_v7  }
 0x18d   : >> { %v3407_v12 = vpack.c.bf16 %v2714_v32, %v2718_v31  ;;  %v596_v10 = vpack.c.bf16 %v2734_v20, %v2742_v0  ;;  %v595_v19 = vpack.c.bf16 %v2746_v59, %v2754_v4  ;;  %v594_v22 = vpack.c.bf16 %v2750_v36, %v2758_v30  ;;  %p3676_p13 = scmp.ge.s32.totalorder %s464_s17, 7   ;;  %s4138_s8 = smov %s464_s17 }
 0x18e   : >> { %1830 = vmatprep.subr.msk.bf16.mxu0 %vm239_vm0, %v3383_v53  ;;  %v519_v11 = vsel %vm239_vm0, %v3383_v53, 0  ;;  %1766 = vmatprep.mubr.msk.bf16.mxu0 %vm239_vm0, %v3397_v58  ;;  %v516_v16 = vsel %vm239_vm0, %v3387_v1, 0  ;;  %v510_v35 = vsel %vm239_vm0, %v3397_v58, 0  ;;  %v593_v14 = vpack.c.bf16 %v2762_v51, %v2770_v56  ;;  %s1733_s25 = sshll.u32 (%p3676_p13), %s2843_s13, 11  ;;  %s1460_s26 = sshll.u32 (%p3676_p13), %s3150_s20, 4  ;;  %s3905_s26 = int_to_ptr.vmem [resolvable:$true] %s1460_s26 }
 0x18f   : >> { %1759 = vmatpush3.bf16.xpose.msra.mxu0 %v519_v11  ;;  %634 = vmatprep.subr.bf16.mxu1 %v597_v3  ;;  %v513_v23 = vsel %vm239_vm0, %v3407_v12, 0  ;;  %v592_v48 = vpack.c.bf16 %v2766_v29, %v2774_v18  ;;  %v591_v8 = vpack.c.bf16 %v2778_v25, %v2786_v15  ;;  %v590_v57 = vpack.c.bf16 %v2782_v17, %v2790_v13  ;;  %s3903_s6 = scalar_lea.hbm (%p3676_p13), %s3954_s2, %s1733_s25  ;;  %s1447_s13 = scalar_lea.sflag (%p3676_p13), [#allocation4], %s2968_s30 }
 0x190   : >> { %1831 = vmatprep.subr.msk.bf16.mxu0 %vm239_vm0, %v3387_v1  ;;  %635 = vmatpush1.bf16.msra.mxu1 %v596_v10  ;;  %v3975_v61 = vmov 0   ;;  %s2398_s7 = scalar_lea.vmem (%p3676_p13), %s3905_s26, 2048  ;;  %p4163_p9 = scmp.ne.s32.totalorder (%p3676_p13), %s4011_s21, 0 }
 0x191   : >> { %636 = vmatprep.subr.bf16.mxu1 %v595_v19  ;;  %658 = vmatprep.mubr.bf16.mxu1 %v3975_v61  ;;  %p2399_p1 = scmp.ne.s32.totalorder (%p3676_p13), %s3905_s26, %s2398_s7  ;;  %s2804_s14 = smov (%p3676_p13), [#allocation7]  }
 0x192   : > { %s2402_s16 = sshll.u32 (%p3676_p13), %s2804_s14, 4  ;;  %s2403_s16 = int_to_ptr.vmem [resolvable:$false] %s2402_s16 }
 0x193   : > { %p2400_p7 = pnand (%p3676_p13), %p2399_p1, %p4163_p9  ;;  %s2404_s4 = scalar_lea.vmem (%p3676_p13), %s2403_s16, 4096 }
 0x194   : >> { %637 = vmatpush1.bf16.msra.mxu1 %v594_v22  ;;  %v4024_v22 = vld [vmem:[#allocation17_spill] sm:$0xff]  ;;  %p2405_p0 = scmp.lt.s32.totalorder (%p3676_p13), %s3905_s26, %s2403_s16  ;;  %p2406_p2 = scmp.lt.s32.totalorder (%p3676_p13), %s2404_s4, %s2398_s7 }
 0x195   : >> { %638 = vmatprep.subr.bf16.mxu1 %v593_v14  ;;  %p2401_p10 = pneg (%p3676_p13), %p2400_p7 }
 0x196   : > { %p2407_p4 = por (%p3676_p13), %p2406_p2, %p2405_p0 }
 0x197   : >> { %1761 = vmatpush3.bf16.xpose.msra.mxu0 %v516_v16 }
 0x198   : >> { %1832 = vmatprep.subr.msk.bf16.mxu0 %vm239_vm0, %v3407_v12  ;;  %639 = vmatpush1.bf16.msra.mxu1 %v592_v48  ;;  %p2408_p3 = pnand (%p3676_p13), %p2407_p4, %p2401_p10 }
 0x199   : >> { %640 = vmatprep.subr.bf16.mxu1 %v591_v8 }
 0x19c   : >> { %641 = vmatpush1.bf16.msra.mxu1 %v590_v57 }
 0x19f   : >> { %1763 = vmatpush3.bf16.xpose.msra.mxu0 %v513_v23 }
 0x1a0   : >> { %1833 = vmatprep.subr.msk.bf16.mxu0 %vm239_vm0, %v3397_v58 }
 0x1a7   : >> { %1765 = vmatpush3.bf16.xpose.msra.mxu0 %v510_v35 }
 0x1ae   : >> { %1767 = vmatmul.mubr.msk.bf16.vlgmr.msra.gmra.mxu0 %vm239_vm0, %v3407_v12 }
 0x1af   : >> { %1770 = vmatprep.mubr.msk.bf16.mxu0 %vm239_vm0, %v3387_v1 }
 0x1b6   : >> { %1771 = vmatmul.mubr.msk.bf16.gmra.mxu0 %vm239_vm0, %v3383_v53 }
 0x26e   : >> { %v1768_v62 = vpop.f32.mrf.mxu0 }
 0x270   : >> { %v555_v60 = vpop.f32.mrf.mxu0 }
 0x272   : >> { %v1769_v5 = vpop.f32.mrf.mxu0 }
 0x273   : >> { %v587_v11 = vpack.c.bf16 %v1769_v5, %v1768_v62 }
 0x274   : >> { %v558_v52 = vpop.f32.mrf.mxu0 }
 0x275   : >> { %v586_v6 = vpack.c.bf16 %v558_v52, %v555_v60 }
 0x276   : >> { %v1772_v2 = vpop.f32.mrf.mxu0 }
 0x277   : >> { %1702 = vmatmul.mubr.msk.bf16.vlgmr.msra.gmra.mxu1 %vm239_vm0, %v586_v6 }
 0x278   : >> { %668 = vmatprep.mubr.bf16.mxu1 %v3975_v61  ;;  %v571_v47 = vpop.f32.mrf.mxu0 }
 0x27a   : >> { %v1773_v3 = vpop.f32.mrf.mxu0 }
 0x27b   : >> { %v589_v19 = vpack.c.bf16 %v1773_v3, %v1772_v2 }
 0x27c   : >> { %v574_v16 = vpop.f32.mrf.mxu0 }
 0x27d   : >> { %v588_v10 = vpack.c.bf16 %v574_v16, %v571_v47 }
 0x27f   : >> { %1703 = vmatmul.mubr.msk.bf16.gmra.mxu1 %vm239_vm0, %v587_v11 }
 0x280   : >> { %678 = vmatprep.mubr.bf16.mxu1 %v3975_v61 }
 0x287   : >> { %1704 = vmatmul.mubr.msk.bf16.gmra.mxu1 %vm239_vm0, %v588_v10 }
 0x288   : >> { %688 = vmatprep.mubr.bf16.mxu1 %v3975_v61 }
 0x28f   : >> { %1705 = vmatmul.mubr.msk.bf16.gmra.mxu1 %vm239_vm0, %v589_v19  ;;  %v598_v19 = vmul.f32 %v2694_v37, %v2790_v13 }
 0x290   : >> { %771 = vmatprep.mubr.bf16.mxu1 %v4024_v22 }
 0x337   : >> { %v660_v23 = vpop.f32.mrf.mxu1 }
 0x338   : >> { %v661_v35 = vadd.f32 1e-06, %v660_v23  ;;  %v600_v23 = vmul.f32 %v2686_v41, %v2782_v17 }
 0x339   : >> { %v662_v14 = vpop.f32.mrf.mxu1 }
 0x33a   : >> { %v663_v48 = vadd.f32 1e-06, %v662_v14  ;;  %2262 = vrcp.f32 %v661_v35 }
 0x33b   : >> { %v664_v8 = vpop.f32.mrf.mxu1 }
 0x33c   : >> { %v665_v57 = vadd.f32 1e-06, %v664_v8  ;;  %2264 = vrcp.f32 %v663_v48  ;;  %v599_v48 = vmul.f32 %v2690_v39, %v2786_v15 }
 0x33d   : >> { %v666_v62 = vpop.f32.mrf.mxu1 }
 0x33e   : >> { %2266 = vrcp.f32 %v665_v57  ;;  %v667_v60 = vadd.f32 1e-06, %v666_v62  ;;  %v601_v62 = vmul.f32 %v2682_v43, %v2778_v25 }
 0x33f   : >> { %v670_v5 = vpop.f32.mrf.mxu1 }
 0x340   : >> { %2268 = vrcp.f32 %v667_v60  ;;  %v671_v52 = vadd.f32 1e-06, %v670_v5 }
 0x341   : >> { %v672_v6 = vpop.f32.mrf.mxu1 }
 0x342   : >> { %v673_v2 = vadd.f32 1e-06, %v672_v6  ;;  %2270 = vrcp.f32 %v671_v52 }
 0x343   : >> { %v674_v47 = vpop.f32.mrf.mxu1 }
 0x344   : >> { %v675_v11 = vadd.f32 1e-06, %v674_v47  ;;  %2272 = vrcp.f32 %v673_v2 }
 0x345   : >> { %v676_v3 = vpop.f32.mrf.mxu1 }
 0x346   : >> { %2274 = vrcp.f32 %v675_v11  ;;  %v677_v16 = vadd.f32 1e-06, %v676_v3 }
 0x347   : >> { %v680_v10 = vpop.f32.mrf.mxu1  ;;  %v2263_v14 = vpop.eup %2262 }
 0x348   : >> { %2276 = vrcp.f32 %v677_v16  ;;  %v681_v35 = vadd.f32 1e-06, %v680_v10  ;;  %v3454_v13 = vmul.f32 %v2263_v14, %v598_v19   ;;  %v602_v10 = vmul.f32 %v2678_v45, %v2774_v18 }
 0x349   : >> { %v682_v8 = vpop.f32.mrf.mxu1  ;;  %v2265_v57 = vpop.eup %2264 }
 0x34a   : >> { %v683_v60 = vadd.f32 1e-06, %v682_v8  ;;  %2278 = vrcp.f32 %v681_v35  ;;  %4025 = vst [vmem:[#allocation19_spill] sm:$0xff] %v3454_v13  ;;  %v4026_v2 = vmov %v3454_v13  ;;  %v3458_v15 = vmul.f32 %v2265_v57, %v599_v48  }
 0x34b   : >> { %v2267_v5 = vpop.eup %2266  ;;  %v684_v52 = vpop.f32.mrf.mxu1  ;;  %v604_v13 = vmul.f32 %v2670_v54, %v2766_v29  ;;  %v605_v8 = vmul.f32 %v2666_v63, %v2762_v51 }
 0x34c   : >> { %v685_v6 = vadd.f32 1e-06, %v684_v52  ;;  %v3456_v17 = vmul.f32 %v2267_v5, %v600_v23   ;;  %2280 = vrcp.f32 %v683_v60  ;;  %4029 = vst [vmem:[#allocation21_spill] sm:$0xff] %v3458_v15  ;;  %v4030_v11 = vmov %v3458_v15 }
 0x34d   : >> { %v2269_v37 = vpop.eup %2268  ;;  %v686_v41 = vpop.f32.mrf.mxu1 }
 0x34e   : >> { %4027 = vst [vmem:[#allocation20_spill] sm:$0xff] %v3456_v17  ;;  %v4028_v47 = vmov %v3456_v17  ;;  %2282 = vrcp.f32 %v685_v6  ;;  %v687_v39 = vadd.f32 1e-06, %v686_v41  ;;  %v3460_v25 = vmul.f32 %v2269_v37, %v601_v62  }
 0x34f   : >> { %v3464_v43 = vpack.c.bf16 %v4028_v47, %v4026_v2  ;;  %v690_v19 = vpop.f32.mrf.mxu1  ;;  %v2271_v35 = vpop.eup %2270  ;;  %v606_v37 = vmul.f32 %v2662_v38, %v2758_v30  ;;  %v608_v41 = vmul.f32 %v2654_v42, %v2750_v36 }
 0x350   : >> { %4031 = vst [vmem:[#allocation22_spill] sm:$0xff] %v3460_v25  ;;  %v4032_v3 = vmov %v3460_v25  ;;  %2284 = vrcp.f32 %v687_v39  ;;  %v691_v17 = vadd.f32 1e-06, %v690_v19  ;;  %v603_v25 = vmul.f32 %v2674_v49, %v2770_v56 }
 0x351   : >> { %4033 = vst [vmem:[#allocation23_spill] sm:$0xff] %v3464_v43  ;;  %v4034_v16 = vmov %v3464_v43  ;;  %v3472_v15 = vpack.c.bf16 %v4032_v3, %v4030_v11  ;;  %v692_v14 = vpop.f32.mrf.mxu1  ;;  %v2273_v48 = vpop.eup %2272  ;;  %v3479_v57 = vmul.f32 %v2271_v35, %v602_v10  }
 0x352   : >> { %v693_v45 = vadd.f32 1e-06, %v692_v14  ;;  %2286 = vrcp.f32 %v691_v17  ;;  %v3483_v56 = vmul.f32 %v2273_v48, %v603_v25  }
 0x353   : >> { %4035 = vst [vmem:[#allocation24_spill] sm:$0xff] %v3472_v15  ;;  %v4036_v23 = vmov %v3472_v15  ;;  %v2275_v18 = vpop.eup %2274  ;;  %v694_v54 = vpop.f32.mrf.mxu1  ;;  %4037 = vst [vmem:[#allocation25_spill] sm:$0xff] %v3479_v57 }
 0x354   : >> { %868 = vmatprep.mubr.bf16.mxu0 %v4036_v23  ;;  %v695_v29 = vadd.f32 1e-06, %v694_v54  ;;  %v3481_v62 = vmul.f32 %v2275_v18, %v604_v13   ;;  %2288 = vrcp.f32 %v693_v45  ;;  %4039 = vst [vmem:[#allocation27_spill] sm:$0xff] %v3483_v56  ;;  %v4040_v52 = vmov %v3483_v56  ;;  %v4076_v45 = vld [vmem:[#allocation14_spill] sm:$0xff]  ;;  %v4078_v18 = vld [vmem:[#allocation16_spill] sm:$0xff] }
 0x355   : >> { %v2277_v60 = vpop.eup %2276  ;;  %v696_v5 = vpop.f32.mrf.mxu1  ;;  %v609_v13 = vmul.f32 %v2650_v44, %v2746_v59  ;;  %v612_v44 = vmul.f32 %v2638_v55, %v2734_v20  ;;  %v4080_v54 = vmov 0  }
 0x356   : >> { %4038 = vst [vmem:[#allocation26_spill] sm:$0xff] %v3481_v62  ;;  %2290 = vrcp.f32 %v695_v29  ;;  %v697_v49 = vadd.f32 1e-06, %v696_v5  ;;  %v3485_v51 = vmul.f32 %v2277_v60, %v605_v8   ;;  %v3489_v63 = vpack.c.bf16 %v3481_v62, %v3479_v57 }
 0x357   : >> { %v2279_v56 = vpop.eup %2278 }
 0x358   : >> { %4041 = vst [vmem:[#allocation28_spill] sm:$0xff] %v3485_v51  ;;  %v4042_v6 = vmov %v3485_v51  ;;  %4043 = vst [vmem:[#allocation29_spill] sm:$0xff] %v3489_v63  ;;  %v4044_v19 = vmov %v3489_v63  ;;  %2292 = vrcp.f32 %v697_v49  ;;  %v607_v51 = vmul.f32 %v2658_v40, %v2754_v4 }
 0x359   : >> { %v3497_v39 = vpack.c.bf16 %v4042_v6, %v4040_v52  ;;  %v2281_v43 = vpop.eup %2280  ;;  %v3503_v30 = vmul.f32 %v2279_v56, %v606_v37   ;;  %v610_v40 = vmul.f32 %v2646_v46, %v2742_v0 }
 0x35a   : >> { %v3507_v4 = vmul.f32 %v2281_v43, %v607_v51  }
 0x35b   : >> { %4045 = vst [vmem:[#allocation30_spill] sm:$0xff] %v3497_v39  ;;  %v4046_v10 = vmov %v3497_v39  ;;  %v2283_v17 = vpop.eup %2282  ;;  %4047 = vst [vmem:[#allocation31_spill] sm:$0xff] %v3503_v30  ;;  %v4048_v35 = vmov %v3503_v30 }
 0x35c   : >> { %v3505_v36 = vmul.f32 %v2283_v17, %v608_v41   ;;  %4051 = vst [vmem:[#allocation33_spill] sm:$0xff] %v3507_v4  ;;  %v4052_v48 = vmov %v3507_v4  ;;  %v611_v4 = vmul.f32 %v2642_v50, %v2738_v21 }
 0x35d   : >> { %v2285_v38 = vpop.eup %2284 }
 0x35e   : >> { %4049 = vst [vmem:[#allocation32_spill] sm:$0xff] %v3505_v36  ;;  %v4050_v14 = vmov %v3505_v36  ;;  %v3509_v59 = vmul.f32 %v2285_v38, %v609_v13  }
 0x35f   : >> { %v3513_v42 = vpack.c.bf16 %v4050_v14, %v4048_v35  ;;  %v2287_v36 = vpop.eup %2286  ;;  %v4077_v14 = vmov %v4076_v45 }
 0x360   : >> { %4053 = vst [vmem:[#allocation34_spill] sm:$0xff] %v3509_v59  ;;  %v4054_v8 = vmov %v3509_v59  ;;  %v613_v59 = vmul.f32 %v2634_v7, %v2730_v9  ;;  %v3527_v0 = vmul.f32 %v2287_v36, %v610_v40   ;;  %v4066_v7 = vld [vmem:[#allocation11_spill] sm:$0xff] }
 0x361   : >> { %4055 = vst [vmem:[#allocation35_spill] sm:$0xff] %v3513_v42  ;;  %v4056_v60 = vmov %v3513_v42  ;;  %v3521_v30 = vpack.c.bf16 %v4054_v8, %v4052_v48  ;;  %v2289_v15 = vpop.eup %2288  ;;  %v4067_v52 = vmov %v4066_v7  ;;  %v4079_v8 = vmov %v4078_v18 }
 0x362   : >> { %v4059_v61 = vmov %v3527_v0  ;;  %v3531_v21 = vmul.f32 %v2289_v15, %v611_v4   ;;  %v4068_v0 = vld [vmem:[#allocation18_spill] sm:$0xff] }
 0x363   : >> { %4057 = vst [vmem:[#allocation36_spill] sm:$0xff] %v3521_v30  ;;  %v4058_v5 = vmov %v3521_v30  ;;  %v2291_v25 = vpop.eup %2290  ;;  %v4069_v62 = vmov %v4068_v0 }
 0x364   : >> { %v3529_v20 = vmul.f32 %v2291_v25, %v612_v44   ;;  %v4061_v11 = vmov %v3531_v21  ;;  %v4072_v21 = vld [vmem:[#allocation12_spill] sm:$0xff] }
 0x365   : >> { %v2293_v46 = vpop.eup %2292  ;;  %v4073_v35 = vmov %v4072_v21 }
 0x366   : >> { %v4060_v2 = vmov %v3529_v20  ;;  %v3533_v9 = vmul.f32 %v2293_v46, %v613_v59   ;;  %v4070_v20 = vld [vmem:[#allocation15_spill] sm:$0xff] }
 0x367   : >> { %v3537_v55 = vpack.c.bf16 %v4060_v2, %v4059_v61  ;;  %v4071_v6 = vmov %v4070_v20 }
 0x368   : >> { %v4062_v47 = vmov %v3533_v9  ;;  %v4074_v9 = vld [vmem:[#allocation13_spill] sm:$0xff] }
 0x369   : >> { %4063 = vst [vmem:[#allocation37_spill] sm:$0xff] %v3537_v55  ;;  %v4064_v3 = vmov %v3537_v55  ;;  %v3541_v50 = vpack.c.bf16 %v4062_v47, %v4061_v11  ;;  %v4075_v48 = vmov %v4074_v9 }
 0x36b   : >> { %v4065_v57 = vmov %v3541_v50 }
 0x36c   : >> { %747 = vmatprep.subr.bf16.mxu1 %v4065_v57  ;;  %844 = vmatprep.subr.bf16.mxu0 %v4065_v57 }
 0x36d   : >> { %748 = vmatpush1.bf16.xpose.msra.mxu1 %v4064_v3  ;;  %845 = vmatpush1.bf16.xpose.msra.mxu0 %v4064_v3 }
 0x36e   : >> { %749 = vmatprep.subr.bf16.mxu1 %v4058_v5  ;;  %846 = vmatprep.subr.bf16.mxu0 %v4058_v5 }
 0x375   : >> { %750 = vmatpush1.bf16.xpose.msra.mxu1 %v4056_v60  ;;  %847 = vmatpush1.bf16.xpose.msra.mxu0 %v4056_v60 }
 0x376   : >> { %751 = vmatprep.subr.bf16.mxu1 %v4046_v10  ;;  %848 = vmatprep.subr.bf16.mxu0 %v4046_v10 }
 0x37d   : >> { %752 = vmatpush1.bf16.xpose.msra.mxu1 %v4044_v19  ;;  %849 = vmatpush1.bf16.xpose.msra.mxu0 %v4044_v19 }
 0x37e   : >> { %753 = vmatprep.subr.bf16.mxu1 %v4036_v23  ;;  %850 = vmatprep.subr.bf16.mxu0 %v4036_v23 }
 0x385   : >> { %754 = vmatpush1.bf16.xpose.msra.mxu1 %v4034_v16  ;;  %851 = vmatpush1.bf16.xpose.msra.mxu0 %v4034_v16 }
 0x386   : >> { %1814 = vmatprep.subr.bf16.mxu1 %v4065_v57  ;;  %1030 = vmatprep.subr.bf16.mxu0 %v4066_v7 }
 0x38c   : >> { %772 = vmatmul.mubr.bf16.vlgmr.msra.gmra.mxu1 %v4068_v0  ;;  %869 = vmatmul.mubr.bf16.vlgmr.msra.gmra.mxu0 %v4034_v16 }
 0x38d   : >> { %1818 = vmatpush1.bf16.xpose.msra.mxu1 %v4064_v3  ;;  %876 = vmatprep.mubr.bf16.mxu0 %v4046_v10 }
 0x38e   : >> { %1815 = vmatprep.subr.bf16.mxu1 %v4058_v5  ;;  %779 = vmatprep.mubr.bf16.mxu1 %v4070_v20 }
 0x38f   : >> { %1031 = vmatpush1.bf16.msra.mxu0 %v4072_v21 }
 0x390   : >> { %1032 = vmatprep.subr.bf16.mxu0 %v4074_v9 }
 0x393   : >> { %1033 = vmatpush1.bf16.msra.mxu0 %v4076_v45 }
 0x394   : >> { %780 = vmatmul.mubr.bf16.gmra.mxu1 %v4078_v18  ;;  %877 = vmatmul.mubr.bf16.gmra.mxu0 %v4044_v19 }
 0x395   : >> { %1819 = vmatpush1.bf16.xpose.msra.mxu1 %v4056_v60  ;;  %787 = vmatprep.mubr.bf16.mxu1 %v4075_v48 }
 0x396   : >> { %1816 = vmatprep.subr.bf16.mxu1 %v4046_v10  ;;  %1034 = vmatprep.subr.bf16.mxu0 %v4071_v6 }
 0x397   : >> { %1035 = vmatpush1.bf16.msra.mxu0 %v4079_v8  ;;  %1054 = vmatprep.mubr.bf16.mxu0 %v4080_v54 }
 0x398   : >> { %1036 = vmatprep.subr.bf16.mxu0 %v4024_v22 }
 0x39b   : >> { %1037 = vmatpush1.bf16.msra.mxu0 %v4069_v62 }
 0x39c   : >> { %788 = vmatmul.mubr.bf16.gmra.mxu1 %v4077_v14 }
 0x39d   : >> { %1820 = vmatpush1.bf16.xpose.msra.mxu1 %v4044_v19  ;;  %795 = vmatprep.mubr.bf16.mxu1 %v4067_v52 }
 0x39e   : >> { %1817 = vmatprep.subr.bf16.mxu1 %v4036_v23 }
 0x3a4   : >> { %796 = vmatmul.mubr.bf16.gmra.mxu1 %v4073_v35 }
 0x3a5   : >> { %1821 = vmatpush1.bf16.xpose.msra.mxu1 %v4034_v16  ;;  %884 = vmatprep.mubr.bf16.mxu1 %v4058_v5 }
 0x3a6   : >> { %1774 = vmatprep.subr.bf16.mxu1 %v3383_v53 }
 0x3ac   : >> { %885 = vmatmul.mubr.bf16.vlgmr.msra.gmra.mxu1 %v4056_v60 }
 0x3ad   : >> { %892 = vmatprep.mubr.bf16.mxu1 %v4065_v57  ;;  %1775 = vmatpush3.bf16.msra.mxu1 %v3383_v53 }
 0x3ae   : >> { %1776 = vmatprep.subr.bf16.mxu1 %v3387_v1 }
 0x3b1   : >> { %1777 = vmatpush3.bf16.msra.mxu1 %v3387_v1 }
 0x3b2   : >> { %1778 = vmatprep.subr.bf16.mxu1 %v3407_v12 }
 0x3b4   : >> { %893 = vmatmul.mubr.bf16.gmra.mxu1 %v4064_v3 }
 0x3b5   : >> { %1779 = vmatpush3.bf16.msra.mxu1 %v3407_v12 }
 0x3b6   : >> { %1780 = vmatprep.subr.bf16.mxu1 %v3397_v58 }
 0x3b9   : >> { %1781 = vmatpush3.bf16.msra.mxu1 %v3397_v58 }
 0x3ba   : > { %1224 = vmatprep.subr.bf16.mxu1 (%p3676_p13), %v4065_v57 }
 0x44c   : >> { %v773_v29 = vpop.f32.mrf.mxu1  ;;  %v870_v49 = vpop.f32.mrf.mxu0 }
 0x44d   : >> { %804 = vxpose.xlu0.b32.start [1/8] (short) (narrow) %v773_v29, 64 }
 0x44e   : >> { %v775_v63 = vpop.f32.mrf.mxu1  ;;  %v872_v37 = vpop.f32.mrf.mxu0 }
 0x450   : >> { %v776_v53 = vpop.f32.mrf.mxu1  ;;  %v873_v41 = vpop.f32.mrf.mxu0 }
 0x451   : >> { %v901_v39 = vpack.c.bf16 %v873_v41, %v870_v49  ;;  %805 = vxpose.xlu0.b32.cont [2/8] (short) (narrow) %v776_v53, 64 }
 0x452   : >> { %v778_v1 = vpop.f32.mrf.mxu1  ;;  %v875_v56 = vpop.f32.mrf.mxu0 }
 0x453   : >> { %1782 = vmatprep.mubr.msk.bf16.mxu1 %vm239_vm0, %v901_v39 }
 0x454   : >> { %v781_v43 = vpop.f32.mrf.mxu1  ;;  %v878_v51 = vpop.f32.mrf.mxu0 }
 0x455   : >> { %806 = vxpose.xlu0.b32.cont [3/8] (short) (narrow) %v781_v43, 64 }
 0x456   : >> { %v783_v12 = vpop.f32.mrf.mxu1  ;;  %v880_v13 = vpop.f32.mrf.mxu0 }
 0x458   : >> { %v784_v17 = vpop.f32.mrf.mxu1  ;;  %v881_v58 = vpop.f32.mrf.mxu0 }
 0x459   : >> { %v902_v38 = vpack.c.bf16 %v881_v58, %v878_v51  ;;  %807 = vxpose.xlu0.b32.cont [4/8] (short) (narrow) %v784_v17, 64 }
 0x45a   : >> { %v786_v42 = vpop.f32.mrf.mxu1  ;;  %v883_v40 = vpop.f32.mrf.mxu0 }
 0x45b   : >> { %1783 = vmatmul.mubr.msk.bf16.vlgmr.msra.gmra.mxu1 %vm239_vm0, %v902_v38 }
 0x45c   : >> { %v789_v44 = vpop.f32.mrf.mxu1 }
 0x45d   : >> { %808 = vxpose.xlu0.b32.cont [5/8] (short) (narrow) %v789_v44, 64 }
 0x45e   : >> { %v791_v30 = vpop.f32.mrf.mxu1 }
 0x460   : >> { %v792_v36 = vpop.f32.mrf.mxu1 }
 0x461   : >> { %809 = vxpose.xlu0.b32.cont [6/8] (short) (narrow) %v792_v36, 64 }
 0x462   : >> { %v794_v15 = vpop.f32.mrf.mxu1 }
 0x464   : >> { %v797_v4 = vpop.f32.mrf.mxu1 }
 0x465   : >> { %810 = vxpose.xlu0.b32.cont [7/8] (short) (narrow) %v797_v4, 64 }
 0x466   : >> { %v799_v59 = vpop.f32.mrf.mxu1 }
 0x468   : >> { %v800_v25 = vpop.f32.mrf.mxu1 }
 0x469   : >> { %811 = vxpose.xlu0.b32.end [8/8] (short) (narrow) %v800_v25, 64 }
 0x46a   : >> { %v802_v46 = vpop.f32.mrf.mxu1 }
 0x46c   : >> { %v886_v55 = vpop.f32.mrf.mxu1 }
 0x46e   : >> { %v888_v50 = vpop.f32.mrf.mxu1 }
 0x470   : >> { %v889_v7 = vpop.f32.mrf.mxu1 }
 0x471   : >> { %v903_v0 = vpack.c.bf16 %v889_v7, %v886_v55 }
 0x472   : >> { %v891_v20 = vpop.f32.mrf.mxu1 }
 0x473   : >> { %1786 = vmatprep.mubr.msk.bf16.mxu1 %vm239_vm0, %v903_v0 }
 0x474   : >> { %v894_v21 = vpop.f32.mrf.mxu1 }
 0x476   : >> { %v896_v9 = vpop.f32.mrf.mxu1 }
 0x478   : >> { %v897_v45 = vpop.f32.mrf.mxu1 }
 0x479   : >> { %v904_v18 = vpack.c.bf16 %v897_v45, %v894_v21 }
 0x47a   : >> { %v899_v29 = vpop.f32.mrf.mxu1 }
 0x47b   : >> { %1787 = vmatmul.mubr.msk.bf16.gmra.mxu1 %vm239_vm0, %v904_v18 }
 0x4c9   : >> { %v820_v41 = vpop.trf.xlu0 }
 0x4ca   : >> { %v905_v13 = vmul.f32 %v2726_v24, %v820_v41 }
 0x4cd   : >> { %v821_v43 = vpop.trf.xlu0 }
 0x4ce   : >> { %v906_v17 = vmul.f32 %v2722_v26, %v821_v43 }
 0x4d1   : >> { %v822_v12 = vpop.trf.xlu0 }
 0x4d2   : >> { %v907_v36 = vmul.f32 %v2718_v31, %v822_v12 }
 0x4d5   : >> { %v823_v42 = vpop.trf.xlu0 }
 0x4d6   : >> { %v908_v44 = vmul.f32 %v2714_v32, %v823_v42 }
 0x4d9   : >> { %v824_v50 = vpop.trf.xlu0 }
 0x4da   : >> { %v909_v18 = vmul.f32 %v2710_v27, %v824_v50 }
 0x4dd   : >> { %v825_v21 = vpop.trf.xlu0 }
 0x4de   : >> { %v910_v29 = vmul.f32 %v2706_v28, %v825_v21  ;;  %v4124_v21 = vmov %v4061_v11 }
 0x4e1   : >> { %v826_v45 = vpop.trf.xlu0 }
 0x4e2   : >> { %v911_v43 = vmul.f32 %v2702_v33, %v826_v45 }
 0x51b   : >> { %v1784_v49 = vpop.f32.mrf.mxu1 }
 0x51c   : >> { %v968_v51 = vadd.f32 1e-06, %v1784_v49 }
 0x51d   : >> { %v959_v63 = vpop.f32.mrf.mxu1 }
 0x51e   : >> { %v960_v37 = vadd.f32 1e-06, %v959_v63 }
 0x51f   : >> { %v1785_v53 = vpop.f32.mrf.mxu1 }
 0x520   : >> { %2294 = vrcp.f32 %v960_v37  ;;  %v971_v56 = vadd.f32 1e-06, %v1785_v53  ;;  %v827_v37 = vpop.trf.xlu0 }
 0x521   : >> { %v962_v39 = vpop.f32.mrf.mxu1  ;;  %v912_v41 = vmul.f32 %v2698_v34, %v827_v37 }
 0x522   : >> { %v963_v1 = vadd.f32 1e-06, %v962_v39 }
 0x524   : >> { %2296 = vrcp.f32 %v963_v1 }
 0x525   : >> { %2298 = vrcp.f32 %v971_v56 }
 0x526   : >> { %2300 = vrcp.f32 %v968_v51 }
 0x52d   : >> { %v2295_v58 = vpop.eup %2294 }
 0x52e   : >> { %v3604_v24 = vmul.f32 %v2295_v58, %v905_v13  }
 0x531   : >> { %v2297_v38 = vpop.eup %2296 }
 0x532   : >> { %v3606_v26 = vmul.f32 %v2297_v38, %v906_v17   ;;  %v2299_v30 = vpop.eup %2298  ;;  %v4135_v17 = vld [vmem:[#allocation20_spill] sm:$0xff] }
 0x533   : >> { %v2301_v15 = vpop.eup %2300  ;;  %v3617_v32 = vmul.f32 %v2299_v30, %v908_v44   ;;  %v4129_v30 = vld [vmem:[#allocation31_spill] sm:$0xff] }
 0x534   : >> { %v3610_v40 = vpack.c.bf16 %v3606_v26, %v3604_v24  ;;  %v3619_v31 = vmul.f32 %v2301_v15, %v907_v36   ;;  %v4127_v36 = vld [vmem:[#allocation32_spill] sm:$0xff]  ;;  %v4136_v15 = vld [vmem:[#allocation21_spill] sm:$0xff]  ;;  %v4142_v26 = vld [vmem:[#allocation35_spill] sm:$0xff] (%p3676_p13) }
 0x536   : >> { %v4081_v53 = vmov %v3610_v40  ;;  %v3623_v59 = vpack.c.bf16 %v3617_v32, %v3619_v31  ;;  %v4145_v31 = vld [vmem:[#allocation29_spill] sm:$0xff] (%p3676_p13)  ;;  %v4146_v32 = vld [vmem:[#allocation24_spill] sm:$0xff] (%p3676_p13) }
 0x537   : >> { %1710 = vmatmul.mubr.msk.bf16.vlgmr.msra.gmra.mxu0 %vm239_vm0, %v4081_v53  ;;  %1329 = vxpose.xlu0.c.b16.start [1/4] (short) (narrow) (%p3676_p13), %v4081_v53, 64  ;;  %v1100_v57 = vsel (%p3676_p13), %vm239_vm0, %v4081_v53, 0 }
 0x538   : >> { %1064 = vmatprep.mubr.bf16.mxu0 %v4080_v54  ;;  %4082 = vst [vmem:[#allocation38_spill] sm:$0xff] %v3623_v59  ;;  %v4083_v1 = vmov %v3623_v59  ;;  %v4126_v59 = vld [vmem:[#allocation34_spill] sm:$0xff] }
 0x53b   : >> { %v1788_v4 = vpop.f32.mrf.mxu1 }
 0x53c   : >> { %v984_v9 = vadd.f32 1e-06, %v1788_v4  ;;  %v4128_v4 = vld [vmem:[#allocation33_spill] sm:$0xff] }
 0x53d   : >> { %v975_v25 = vpop.f32.mrf.mxu1 }
 0x53e   : >> { %v976_v46 = vadd.f32 1e-06, %v975_v25  ;;  %v4134_v25 = vld [vmem:[#allocation22_spill] sm:$0xff] }
 0x53f   : >> { %1711 = vmatmul.mubr.msk.bf16.gmra.mxu0 %vm239_vm0, %v4083_v1  ;;  %v1789_v55 = vpop.f32.mrf.mxu1 }
 0x540   : >> { %1074 = vmatprep.mubr.bf16.mxu0 %v4080_v54  ;;  %2302 = vrcp.f32 %v976_v46  ;;  %v987_v20 = vadd.f32 1e-06, %v1789_v55 }
 0x541   : >> { %v978_v7 = vpop.f32.mrf.mxu1 }
 0x542   : >> { %v979_v0 = vadd.f32 1e-06, %v978_v7 }
 0x544   : >> { %2304 = vrcp.f32 %v979_v0  ;;  %v4125_v0 = vmov %v4059_v61 }
 0x545   : >> { %2306 = vrcp.f32 %v987_v20  ;;  %v4123_v20 = vmov %v4060_v2 }
 0x546   : >> { %2308 = vrcp.f32 %v984_v9  ;;  %v4122_v9 = vmov %v4062_v47 }
 0x54d   : >> { %v2303_v49 = vpop.eup %2302 }
 0x54e   : >> { %v1002_v27 = vmul.f32 %v2303_v49, %v909_v18   ;;  %v4133_v18 = vld [vmem:[#allocation25_spill] sm:$0xff] }
 0x551   : >> { %v2305_v63 = vpop.eup %2304 }
 0x552   : >> { %v1003_v28 = vmul.f32 %v2305_v63, %v910_v29   ;;  %v2307_v56 = vpop.eup %2306  ;;  %v4131_v29 = vld [vmem:[#allocation26_spill] sm:$0xff] }
 0x553   : >> { %v2309_v51 = vpop.eup %2308  ;;  %v1005_v34 = vmul.f32 %v2307_v56, %v912_v41   ;;  %v4132_v56 = vld [vmem:[#allocation27_spill] sm:$0xff] }
 0x554   : >> { %v3631_v39 = vpack.c.bf16 %v1003_v28, %v1002_v27  ;;  %v1004_v33 = vmul.f32 %v2309_v51, %v911_v43   ;;  %v4130_v51 = vld [vmem:[#allocation28_spill] sm:$0xff]  ;;  %v4143_v27 = vld [vmem:[#allocation30_spill] sm:$0xff] (%p3676_p13) }
 0x555   : > { %v4144_v28 = vld [vmem:[#allocation38_spill] sm:$0xff] (%p3676_p13) }
 0x556   : >> { %v4084_v12 = vmov %v3631_v39  ;;  %v3637_v13 = vpack.c.bf16 %v1005_v34, %v1004_v33  ;;  %1330 = vxpose.xlu0.c.b16.cont [2/4] (short) (narrow) (%p3676_p13), %v4144_v28, 64  ;;  %v1103_v33 = vsel (%p3676_p13), %vm239_vm0, %v4144_v28, 0  ;;  %v4147_v34 = vld [vmem:[#allocation23_spill] sm:$0xff] (%p3676_p13) }
 0x557   : >> { %1712 = vmatmul.mubr.msk.bf16.gmra.mxu0 %vm239_vm0, %v4084_v12  ;;  %v1106_v24 = vsel (%p3676_p13), %vm239_vm0, %v4084_v12, 0 }
 0x558   : >> { %1084 = vmatprep.mubr.bf16.mxu0 %v4080_v54  ;;  %v4085_v58 = vmov %v3637_v13  ;;  %v4137_v13 = vld [vmem:[#allocation19_spill] sm:$0xff] }
 0x559   : > { %1834 = vmatprep.subr.msk.bf16.mxu0 (%p3676_p13), %vm239_vm0, %v4085_v58  ;;  %v4139_v13 = vld [vmem:[#allocation37_spill] sm:$0xff] (%p3676_p13) }
 0x55a   : > { %1225 = vmatpush1.bf16.msra.mxu1 (%p3676_p13), %v4139_v13  ;;  %1331 = vxpose.xlu0.c.b16.cont [3/4] (short) (narrow) (%p3676_p13), %v4084_v12, 64 }
 0x55e   : > { %1332 = vxpose.xlu0.c.b16.end [4/4] (short) (narrow) (%p3676_p13), %v4085_v58, 64 }
 0x55f   : >> { %1713 = vmatmul.mubr.msk.bf16.gmra.mxu0 %vm239_vm0, %v4085_v58 }
 0x560   : > { %1798 = vmatprep.mubr.msk.bf16.mxu0 (%p3676_p13), %vm239_vm0, %v4081_v53 }
 0x5f7   : >> { %v3641_v37 = vpop.f32.mrf.mxu0  }
 0x5f8   : >> { %4086 = vst [vmem:[#allocation39_spill] sm:$0xff] %v3641_v37  ;;  %v4087_v6 = vmov %v3641_v37 }
 0x5f9   : >> { %v3643_v39 = vpop.f32.mrf.mxu0   ;;  %v4121_v37 = vmov %v4087_v6  ;;  %v1109_v6 = vsel (%p3676_p13), %vm239_vm0, %v4085_v58, 0 }
 0x5fa   : >> { %4088 = vst [vmem:[#allocation40_spill] sm:$0xff] %v3643_v39  ;;  %v4089_v8 = vmov %v3643_v39  ;;  %1791 = vmatpush3.bf16.xpose.msra.mxu0 (%p3676_p13), %v1109_v6 }
 0x5fb   : >> { %v3645_v41 = vpop.f32.mrf.mxu0   ;;  %v4120_v39 = vmov %v4089_v8  ;;  %1835 = vmatprep.subr.msk.bf16.mxu0 (%p3676_p13), %vm239_vm0, %v4084_v12  ;;  %v4141_v8 = vmov (%p3676_p13), 0  }
 0x5fc   : >> { %4090 = vst [vmem:[#allocation41_spill] sm:$0xff] %v3645_v41  ;;  %v4091_v14 = vmov %v3645_v41  ;;  %1248 = vmatprep.mubr.bf16.mxu1 (%p3676_p13), %v4141_v8 }
 0x5fd   : >> { %v3647_v43 = vpop.f32.mrf.mxu0   ;;  %v4119_v41 = vmov %v4091_v14  ;;  %v4140_v14 = vld [vmem:[#allocation36_spill] sm:$0xff] (%p3676_p13) }
 0x5fe   : >> { %v4092_v22 = vmov %v3647_v43  ;;  %1226 = vmatprep.subr.bf16.mxu1 (%p3676_p13), %v4140_v14 }
 0x5ff   : >> { %v3649_v45 = vpop.f32.mrf.mxu0   ;;  %v4118_v43 = vmov %v4092_v22  ;;  %1227 = vmatpush1.bf16.msra.mxu1 (%p3676_p13), %v4142_v26 }
 0x600   : >> { %v4093_v35 = vmov %v3649_v45  ;;  %1228 = vmatprep.subr.bf16.mxu1 (%p3676_p13), %v4143_v27 }
 0x601   : >> { %v3651_v49 = vpop.f32.mrf.mxu0   ;;  %v4117_v45 = vmov %v4093_v35 }
 0x602   : >> { %v4094_v48 = vmov %v3651_v49  ;;  %1793 = vmatpush3.bf16.xpose.msra.mxu0 (%p3676_p13), %v1106_v24 }
 0x603   : >> { %v3653_v54 = vpop.f32.mrf.mxu0   ;;  %v4116_v49 = vmov %v4094_v48  ;;  %1836 = vmatprep.subr.msk.bf16.mxu0 (%p3676_p13), %vm239_vm0, %v4144_v28  ;;  %1229 = vmatpush1.bf16.msra.mxu1 (%p3676_p13), %v4145_v31 }
 0x604   : >> { %v4095_v52 = vmov %v3653_v54  ;;  %1230 = vmatprep.subr.bf16.mxu1 (%p3676_p13), %v4146_v32 }
 0x605   : >> { %v3655_v63 = vpop.f32.mrf.mxu0   ;;  %v4115_v54 = vmov %v4095_v52 }
 0x606   : >> { %v4096_v62 = vmov %v3655_v63 }
 0x607   : >> { %v4114_v63 = vmov %v4096_v62  ;;  %1231 = vmatpush1.bf16.msra.mxu1 (%p3676_p13), %v4147_v34 }
 0x60a   : > { %1795 = vmatpush3.bf16.xpose.msra.mxu0 (%p3676_p13), %v1103_v33 }
 0x60b   : > { %1837 = vmatprep.subr.msk.bf16.mxu0 (%p3676_p13), %vm239_vm0, %v4081_v53 }
 0x612   : > { %1797 = vmatpush3.bf16.xpose.msra.mxu0 (%p3676_p13), %v1100_v57 }
 0x617   : >> { %v3657_v38 = vpop.f32.mrf.mxu0  }
 0x618   : >> { %v4097_v16 = vmov %v3657_v38 }
 0x619   : >> { %v3659_v40 = vpop.f32.mrf.mxu0   ;;  %v4113_v38 = vmov %v4097_v16  ;;  %1799 = vmatmul.mubr.msk.bf16.vlgmr.msra.gmra.mxu0 (%p3676_p13), %vm239_vm0, %v4144_v28 }
 0x61a   : >> { %v4098_v23 = vmov %v3659_v40  ;;  %1802 = vmatprep.mubr.msk.bf16.mxu0 (%p3676_p13), %vm239_vm0, %v4084_v12 }
 0x61b   : >> { %v3661_v42 = vpop.f32.mrf.mxu0   ;;  %v4112_v40 = vmov %v4098_v23 }
 0x61c   : >> { %v4099_v19 = vmov %v3661_v42 }
 0x61d   : >> { %v3663_v44 = vpop.f32.mrf.mxu0   ;;  %v4111_v42 = vmov %v4099_v19 }
 0x61e   : >> { %v4100_v1 = vmov %v3663_v44 }
 0x61f   : >> { %v3665_v46 = vpop.f32.mrf.mxu0   ;;  %v4110_v44 = vmov %v4100_v1 }
 0x620   : >> { %v4101_v10 = vmov %v3665_v46 }
 0x621   : >> { %v3667_v50 = vpop.f32.mrf.mxu0   ;;  %v4109_v46 = vmov %v4101_v10  ;;  %1803 = vmatmul.mubr.msk.bf16.gmra.mxu0 (%p3676_p13), %vm239_vm0, %v4085_v58 }
 0x622   : >> { %v4102_v60 = vmov %v3667_v50  ;;  %1389 = vmatprep.mubr.bf16.mxu0 (%p3676_p13), %v4141_v8 }
 0x623   : >> { %v3669_v55 = vpop.f32.mrf.mxu0   ;;  %v4108_v50 = vmov %v4102_v60  ;;  %463 = sbr.rel (!%p3676_p13) target bundleno = 396 (0x18c), region = 93 }
 0x624   : >> { %v4103_v5 = vmov %v3669_v55 }
 0x625   : >> { %v3671_v7 = vpop.f32.mrf.mxu0   ;;  %v4107_v55 = vmov %v4103_v5 }
 0x626   : >> { %v4104_v3 = vmov %v3671_v7 }
 0x627   : >> { %v4106_v7 = vmov %v4104_v3 }
 0x6d9   : > { %v1800_v6 = vpop.f32.mrf.mxu0 }
 0x6db   : > { %v1145_v14 = vpop.f32.mrf.mxu0 }
 0x6dd   : > { %v1801_v54 = vpop.f32.mrf.mxu0 }
 0x6de   : > { %v1177_v53 = vpack.c.bf16 %v1801_v54, %v1800_v6  ;;  %v1202_v6 = vmul.f32 %v4103_v5, %v4060_v2  ;;  %v1201_v54 = vmul.f32 %v4102_v60, %v4061_v11 }
 0x6df   : > { %v1148_v17 = vpop.f32.mrf.mxu0 }
 0x6e0   : > { %v1176_v38 = vpack.c.bf16 %v1148_v17, %v1145_v14  ;;  %v1203_v17 = vmul.f32 %v4104_v3, %v4062_v47 }
 0x6e1   : > { %v1804_v42 = vpop.f32.mrf.mxu0 }
 0x6e2   : > { %1718 = vmatmul.mubr.msk.bf16.vlgmr.msra.gmra.mxu1 %vm239_vm0, %v1176_v38  ;;  %v4148_v38 = vld [vmem:[#allocation34_spill] sm:$0xff] }
 0x6e3   : > { %1258 = vmatprep.mubr.bf16.mxu1 %v4141_v8  ;;  %v1161_v40 = vpop.f32.mrf.mxu0 }
 0x6e5   : > { %v1805_v44 = vpop.f32.mrf.mxu0 }
 0x6e6   : > { %v1179_v15 = vpack.c.bf16 %v1805_v44, %v1804_v42  ;;  %v1199_v42 = vmul.f32 %v4100_v1, %v4148_v38 }
 0x6e7   : > { %v1164_v30 = vpop.f32.mrf.mxu0 }
 0x6e8   : > { %v1178_v36 = vpack.c.bf16 %v1164_v30, %v1161_v40  ;;  %v4149_v30 = vld [vmem:[#allocation33_spill] sm:$0xff] }
 0x6ea   : > { %1719 = vmatmul.mubr.msk.bf16.gmra.mxu1 %vm239_vm0, %v1177_v53  ;;  %v1200_v53 = vmul.f32 %v4101_v10, %v4059_v61 }
 0x6eb   : > { %1268 = vmatprep.mubr.bf16.mxu1 %v4141_v8 }
 0x6f2   : > { %1720 = vmatmul.mubr.msk.bf16.gmra.mxu1 %vm239_vm0, %v1178_v36  ;;  %v1197_v36 = vmul.f32 %v4098_v23, %v4149_v30 }
 0x6f3   : > { %1278 = vmatprep.mubr.bf16.mxu1 %v4141_v8 }
 0x6fa   : > { %1721 = vmatmul.mubr.msk.bf16.gmra.mxu1 %vm239_vm0, %v1179_v15  ;;  %v4150_v15 = vld [vmem:[#allocation32_spill] sm:$0xff] }
 0x6fb   : > { %1409 = vmatprep.mubr.bf16.mxu1 %v4141_v8  ;;  %v1198_v11 = vmul.f32 %v4099_v19, %v4150_v15 }
 0x7a2   : > { %v1250_v4 = vpop.f32.mrf.mxu1 }
 0x7a3   : > { %v1251_v33 = vadd.f32 1e-06, %v1250_v4 }
 0x7a4   : > { %v1252_v59 = vpop.f32.mrf.mxu1 }
 0x7a5   : > { %v1253_v31 = vadd.f32 1e-06, %v1252_v59  ;;  %v4151_v59 = vld [vmem:[#allocation28_spill] sm:$0xff] }
 0x7a6   : > { %v1254_v25 = vpop.f32.mrf.mxu1  ;;  %v1195_v1 = vmul.f32 %v4096_v62, %v4151_v59 }
 0x7a7   : > { %v1255_v32 = vadd.f32 1e-06, %v1254_v25 }
 0x7a8   : > { %v1256_v46 = vpop.f32.mrf.mxu1 }
 0x7a9   : > { %v1257_v27 = vadd.f32 1e-06, %v1256_v46 }
 0x7aa   : > { %v1260_v55 = vpop.f32.mrf.mxu1 }
 0x7ab   : > { %v1261_v28 = vadd.f32 1e-06, %v1260_v55  ;;  %v4152_v55 = vld [vmem:[#allocation31_spill] sm:$0xff] }
 0x7ac   : > { %v1262_v50 = vpop.f32.mrf.mxu1  ;;  %v1196_v61 = vmul.f32 %v4097_v16, %v4152_v55 }
 0x7ad   : > { %v1263_v24 = vadd.f32 1e-06, %v1262_v50 }
 0x7ae   : > { %v1264_v7 = vpop.f32.mrf.mxu1 }
 0x7af   : > { %v1265_v26 = vadd.f32 1e-06, %v1264_v7  ;;  %v4153_v7 = vld [vmem:[#allocation27_spill] sm:$0xff] }
 0x7b0   : > { %v1266_v0 = vpop.f32.mrf.mxu1 }
 0x7b1   : > { %v1267_v51 = vadd.f32 1e-06, %v1266_v0  ;;  %v1193_v0 = vmul.f32 %v4094_v48, %v4153_v7 }
 0x7b2   : > { %v1270_v20 = vpop.f32.mrf.mxu1 }
 0x7b3   : > { %v1271_v13 = vadd.f32 1e-06, %v1270_v20 }
 0x7b4   : > { %v1272_v21 = vpop.f32.mrf.mxu1 }
 0x7b5   : > { %v1273_v18 = vadd.f32 1e-06, %v1272_v21 }
 0x7b6   : > { %v1274_v9 = vpop.f32.mrf.mxu1 }
 0x7b7   : > { %2310 = vrcp.f32 %v1273_v18  ;;  %v1275_v56 = vadd.f32 1e-06, %v1274_v9  ;;  %v4154_v9 = vld [vmem:[#allocation26_spill] sm:$0xff] }
 0x7b8   : > { %v1276_v45 = vpop.f32.mrf.mxu1 }
 0x7b9   : > { %v1277_v49 = vadd.f32 1e-06, %v1276_v45  ;;  %v1194_v45 = vmul.f32 %v4095_v52, %v4154_v9 }
 0x7ba   : > { %v1280_v29 = vpop.f32.mrf.mxu1 }
 0x7bb   : > { %v1281_v41 = vadd.f32 1e-06, %v1280_v29  ;;  %2312 = vrcp.f32 %v1277_v49  ;;  %v4155_v49 = vld [vmem:[#allocation22_spill] sm:$0xff] }
 0x7bc   : > { %v1282_v63 = vpop.f32.mrf.mxu1  ;;  %v1191_v16 = vmul.f32 %v4092_v22, %v4155_v49  ;;  %v4160_v22 = vld [vmem:[#allocation41_spill] sm:$0xff] }
 0x7bd   : > { %v1283_v37 = vadd.f32 1e-06, %v1282_v63 }
 0x7be   : > { %v1284_v39 = vpop.f32.mrf.mxu1 }
 0x7bf   : > { %v1285_v12 = vadd.f32 1e-06, %v1284_v39  ;;  %2314 = vrcp.f32 %v1283_v37  ;;  %v1337_v39 = vpop.trf.xlu0 }
 0x7c0   : > { %v1286_v43 = vpop.f32.mrf.mxu1 }
 0x7c1   : > { %2316 = vrcp.f32 %v1285_v12  ;;  %v1287_v58 = vadd.f32 1e-06, %v1286_v43  ;;  %v4158_v43 = vld [vmem:[#allocation40_spill] sm:$0xff] }
 0x7c2   : > { %2318 = vrcp.f32 %v1281_v41  ;;  %v4156_v41 = vld [vmem:[#allocation25_spill] sm:$0xff] }
 0x7c3   : > { %2320 = vrcp.f32 %v1287_v58  ;;  %v1192_v48 = vmul.f32 %v4093_v35, %v4156_v41  ;;  %v1338_v38 = vpop.trf.xlu0 }
 0x7c4   : > { %2322 = vrcp.f32 %v1275_v56  ;;  %v2311_v34 = vpop.eup %2310  ;;  %v4157_v56 = vld [vmem:[#allocation21_spill] sm:$0xff] }
 0x7c5   : > { %2324 = vrcp.f32 %v1267_v51  ;;  %v1314_v23 = vmul.f32 %v2311_v34, %v1197_v36  ;;  %v1189_v51 = vmul.f32 %v4158_v43, %v4157_v56  ;;  %v4162_v34 = vld [vmem:[#allocation39_spill] sm:$0xff] }
 0x7c6   : > { %2326 = vrcp.f32 %v1271_v13 }
 0x7c7   : > { %2328 = vrcp.f32 %v1263_v24 }
 0x7c8   : > { %2330 = vrcp.f32 %v1265_v26  ;;  %v2313_v57 = vpop.eup %2312  ;;  %v4159_v26 = vld [vmem:[#allocation20_spill] sm:$0xff] }
 0x7c9   : > { %2332 = vrcp.f32 %v1257_v27  ;;  %v1316_v3 = vmul.f32 %v2313_v57, %v1199_v42  ;;  %v1190_v27 = vmul.f32 %v4160_v22, %v4159_v26 }
 0x7ca   : > { %2334 = vrcp.f32 %v1261_v28 }
 0x7cb   : > { %2336 = vrcp.f32 %v1253_v31  ;;  %v1326_v62 = vpack.c.bf16 %v1316_v3, %v1314_v23 }
 0x7cc   : > { %2338 = vrcp.f32 %v1255_v32  ;;  %v2315_v14 = vpop.eup %2314 }
 0x7cd   : > { %2340 = vrcp.f32 %v1251_v33  ;;  %v1318_v4 = vmul.f32 %v2315_v14, %v1201_v54  ;;  %v4161_v33 = vld [vmem:[#allocation19_spill] sm:$0xff] }
 0x7ce   : > { %v2317_v40 = vpop.eup %2316  ;;  %v1188_v57 = vmul.f32 %v4162_v34, %v4161_v33 }
 0x7cf   : > { %v2319_v44 = vpop.eup %2318  ;;  %v1319_v5 = vmul.f32 %v2317_v40, %v1202_v6 }
 0x7d0   : > { %v2321_v2 = vpop.eup %2320  ;;  %v1317_v46 = vmul.f32 %v2319_v44, %v1200_v53  ;;  %v1339_v44 = vpop.trf.xlu0 }
 0x7d1   : > { %v2323_v60 = vpop.eup %2322  ;;  %v1320_v47 = vmul.f32 %v2321_v2, %v1203_v17 }
 0x7d2   : > { %v2325_v25 = vpop.eup %2324  ;;  %v1327_v19 = vpack.c.bf16 %v1319_v5, %v1317_v46  ;;  %v1315_v21 = vmul.f32 %v2323_v60, %v1198_v11 }
 0x7d3   : > { %v2327_v10 = vpop.eup %2326  ;;  %v1328_v50 = vpack.c.bf16 %v1320_v47, %v1318_v4  ;;  %v1312_v29 = vmul.f32 %v2325_v25, %v1195_v1 }
 0x7d4   : > { %v2329_v20 = vpop.eup %2328  ;;  %v1313_v37 = vmul.f32 %v2327_v10, %v1196_v61  ;;  %v1340_v30 = vpop.trf.xlu0 }
 0x7d5   : > { %v2331_v18 = vpop.eup %2330  ;;  %1365 = vmatprep.subr.bf16.mxu0 %v1328_v50  ;;  %1822 = vmatprep.subr.bf16.mxu1 %v1328_v50  ;;  %v1310_v52 = vmul.f32 %v2329_v20, %v1193_v0 }
 0x7d6   : > { %v2333_v63 = vpop.eup %2332  ;;  %1366 = vmatpush1.bf16.msra.mxu0 %v1327_v19  ;;  %1826 = vmatpush1.bf16.msra.mxu1 %v1327_v19  ;;  %v1325_v13 = vpack.c.bf16 %v1315_v21, %v1313_v37  ;;  %v1311_v24 = vmul.f32 %v2331_v18, %v1194_v45 }
 0x7d7   : > { %v2335_v12 = vpop.eup %2334  ;;  %1367 = vmatprep.subr.bf16.mxu0 %v1326_v62  ;;  %1823 = vmatprep.subr.bf16.mxu1 %v1326_v62  ;;  %v1324_v31 = vpack.c.bf16 %v1312_v29, %v1310_v52  ;;  %v1308_v32 = vmul.f32 %v2333_v63, %v1191_v16 }
 0x7d8   : > { %v2337_v58 = vpop.eup %2336  ;;  %v1309_v35 = vmul.f32 %v2335_v12, %v1192_v48 }
 0x7d9   : > { %v2339_v28 = vpop.eup %2338  ;;  %v1306_v14 = vmul.f32 %v2337_v58, %v1189_v51 }
 0x7da   : > { %1368 = vmatpush1.bf16.msra.mxu0 %v1325_v13  ;;  %1827 = vmatpush1.bf16.msra.mxu1 %v1325_v13  ;;  %v2341_v6 = vpop.eup %2340  ;;  %v1323_v54 = vpack.c.bf16 %v1311_v24, %v1309_v35  ;;  %v1307_v17 = vmul.f32 %v2339_v28, %v1190_v27 }
 0x7db   : > { %1369 = vmatprep.subr.bf16.mxu0 %v1324_v31  ;;  %1824 = vmatprep.subr.bf16.mxu1 %v1324_v31  ;;  %v1322_v42 = vpack.c.bf16 %v1308_v32, %v1306_v14  ;;  %v1305_v40 = vmul.f32 %v2341_v6, %v1188_v57 }
 0x7dd   : > { %v1321_v53 = vpack.c.bf16 %v1307_v17, %v1305_v40 }
 0x7de   : > { %1370 = vmatpush1.bf16.msra.mxu0 %v1323_v54  ;;  %1828 = vmatpush1.bf16.msra.mxu1 %v1323_v54 }
 0x7df   : > { %1371 = vmatprep.subr.bf16.mxu0 %v1322_v42  ;;  %1825 = vmatprep.subr.bf16.mxu1 %v1322_v42 }
 0x7e2   : > { %1372 = vmatpush1.bf16.msra.mxu0 %v1321_v53  ;;  %1829 = vmatpush1.bf16.msra.mxu1 %v1321_v53 }
 0x7e5   : > { %1722 = vmatmul.mubr.msk.bf16.vlgmr.msra.gmra.mxu0 %vm239_vm0, %v1337_v39  ;;  %1724 = vmatmul.mubr.msk.bf16.vlgmr.msra.gmra.mxu1 %vm239_vm0, %v1339_v44 }
 0x7e6   : > { %1399 = vmatprep.mubr.bf16.mxu0 %v4141_v8  ;;  %1419 = vmatprep.mubr.bf16.mxu1 %v4141_v8 }
 0x7ed   : > { %1723 = vmatmul.mubr.msk.bf16.gmra.mxu0 %vm239_vm0, %v1338_v38  ;;  %1725 = vmatmul.mubr.msk.bf16.gmra.mxu1 %vm239_vm0, %v1340_v30 }
 0x8a5   : > { %v1391_v36 = vpop.f32.mrf.mxu0  ;;  %v1411_v2 = vpop.f32.mrf.mxu1 }
 0x8a6   : > { %1430 = vst [vmem:[%s3150_s20] sm:$0xff] %v1391_v36  ;;  %1438 = vst [vmem:[%s3150_s20 + $0x40] sm:$0xff] %v1411_v2 }
 0x8a7   : > { %v1393_v5 = vpop.f32.mrf.mxu0  ;;  %v1413_v15 = vpop.f32.mrf.mxu1 }
 0x8a8   : > { %1431 = vst [vmem:[%s3150_s20 + $0x8] sm:$0xff] %v1393_v5  ;;  %1439 = vst [vmem:[%s3150_s20 + $0x48] sm:$0xff] %v1413_v15 }
 0x8a9   : > { %v1395_v8 = vpop.f32.mrf.mxu0  ;;  %v1415_v11 = vpop.f32.mrf.mxu1 }
 0x8aa   : > { %1432 = vst [vmem:[%s3150_s20 + $0x10] sm:$0xff] %v1395_v8  ;;  %1440 = vst [vmem:[%s3150_s20 + $0x50] sm:$0xff] %v1415_v11 }
 0x8ab   : > { %v1397_v60 = vpop.f32.mrf.mxu0  ;;  %v1417_v4 = vpop.f32.mrf.mxu1 }
 0x8ac   : > { %1433 = vst [vmem:[%s3150_s20 + $0x18] sm:$0xff] %v1397_v60  ;;  %1441 = vst [vmem:[%s3150_s20 + $0x58] sm:$0xff] %v1417_v4 }
 0x8ad   : > { %v1401_v47 = vpop.f32.mrf.mxu0  ;;  %v1421_v3 = vpop.f32.mrf.mxu1 }
 0x8ae   : > { %1434 = vst [vmem:[%s3150_s20 + $0x20] sm:$0xff] %v1401_v47  ;;  %1442 = vst [vmem:[%s3150_s20 + $0x60] sm:$0xff] %v1421_v3 }
 0x8af   : > { %v1403_v59 = vpop.f32.mrf.mxu0  ;;  %v1423_v1 = vpop.f32.mrf.mxu1 }
 0x8b0   : > { %1435 = vst [vmem:[%s3150_s20 + $0x28] sm:$0xff] %v1403_v59  ;;  %1443 = vst [vmem:[%s3150_s20 + $0x68] sm:$0xff] %v1423_v1 }
 0x8b1   : > { %v1405_v25 = vpop.f32.mrf.mxu0  ;;  %v1425_v46 = vpop.f32.mrf.mxu1 }
 0x8b2   : > { %1436 = vst [vmem:[%s3150_s20 + $0x30] sm:$0xff] %v1405_v25  ;;  %1444 = vst [vmem:[%s3150_s20 + $0x70] sm:$0xff] %v1425_v46 }
 0x8b3   : > { %v1407_v55 = vpop.f32.mrf.mxu0  ;;  %v1427_v61 = vpop.f32.mrf.mxu1 }
 0x8b4   : > { %1437 = vst [vmem:[%s3150_s20 + $0x38] sm:$0xff] %v1407_v55  ;;  %1445 = vst [vmem:[%s3150_s20 + $0x78] sm:$0xff] %v1427_v61 }
 0x8b5   : > { %2411 = shalt.err (!%p2408_p3)
}
 0x8b6   : > { %s2412_s19 = scalar_lea.hbm %s3903_s6, 2048  ;;  %s2416_s3 = scalar_lea.hbm %s3954_s2, 4096 }
 0x8b7   : > { %p2413_p5 = scmp.ne.s32.totalorder %s3903_s6, %s2412_s19  ;;  %p2417_p8 = scmp.lt.s32.totalorder %s3903_s6, %s3954_s2 }
 0x8b8   : > { %p2418_p6 = scmp.lt.s32.totalorder %s2416_s3, %s2412_s19 }
 0x8b9   : > { %p2414_p11 = pnand %p2413_p5, %p4163_p9 }
 0x8ba   : > { %p2419_p13 = por %p2418_p6, %p2417_p8 }
 0x8bb   : > { %p2415_p12 = pneg %p2414_p11 }
 0x8bd   : > { %p2420_p1 = pnand %p2419_p13, %p2415_p12 }
 0x8bf   : > { %2423 = shalt.err (!%p2420_p1)
}
 0x8c0   : > { %s2805_s8 = smov 256   ;;  %s2806_s17 = smov 16  }
 0x8c1   : > { %1842 = dma.vmem_to_hbm [thread:$0]  (%p4163_p9), %s3905_s26, 2048, %s3903_s6, %s1447_s13, %s2805_s8, %s2805_s8, %s2806_s17  }
 0x8c2 PF: > { %s1475_s28 = sand.u32 1, %s2618_s9   ;;  %p4164_p7 = scmp.ne.s32.totalorder %s4012_s22, 0 }
 0x8c3   : > { %p4165_p10 = scmp.ge.s32.totalorder %s2630_s12, 2  ;;  %s1476_s25 = scalar_lea.sflag [#allocation4], %s1475_s28 }
 0x8c5   : > { %p1852_p0 = pnand %p4165_p10, %p4164_p7 }
 0x8c7   : > { %p1853_p2 = pneg %p1852_p0 }
 0x8c9   : > { %2613 = dma.done.wait (%p1853_p2), %s1476_s25, 2048  }
 0x8ca   : > { %2615 = vsyncadd (%p1853_p2), %s1476_s25, 4294965248  ;;  %p18_p4 = scmp.ge.s32.totalorder %s2847_s15, 4   ;;  %s4166_s9 = smov %s2622_s10 }
 0x8cb   : > { %s4167_s10 = smov %s2626_s11  ;;  %s4168_s11 = smov %s2859_s18 }
 0x8cc   : > { %s4169_s12 = smov %s2847_s15  ;;  %20 = sbr.rel (!%p18_p4) target bundleno = 7 (0x7), region = 104 }
 0x8d1   :  { %1481 = vsyncpa [#allocation3], 1 }
 0x8d2   :  { %1483 = vsyncpa [#allocation3 + $0x1], 1 }
 0x8d3   :  { %1484 = vsyncpa [#allocation6], 1 }
 0x8d4   :  { %1486 = vsyncpa [#allocation6 + $0x1], 1 }
 0x8d5   :  { %1487 = vsyncpa [#allocation4], 1 }
 0x8d6   :  { %1489 = vsyncpa [#allocation4 + $0x1], 1 }

</bundles_post_ra>
